<compile_context>
chip_gen: v5e
topology: v5e:2x2
jax: 0.10.0
libtpu: 0.0.40
codegen_flags: <defaults>
</compile_context>

<pallas_src>
import functools

import jax
import jax.numpy as jnp
from jax.experimental import pallas as pl
from jax.experimental.pallas import tpu as pltpu


def _mlp_kernel(x_ref, idx_ref, w1x_ref, w1e_ref, b1_ref, w2_ref, b2_ref,
                w3t_ref, b3_ref, o_ref, *, offsets, compute_dtype):
    cd = compute_dtype
    x = x_ref[...]                                    # (TB, F)  float32
    idx = idx_ref[...]                                # (TB, 4)  int32 (raw, un-offset)
    tb = x.shape[0]
    vp = w1e_ref.shape[0]

    # Multi-hot over the combined (offset) categorical vocabulary, built on the VPU.
    # Offsets are Python constants; ranges are disjoint so OR of one-hots == sum.
    lanes = jax.lax.broadcasted_iota(jnp.int32, (tb, vp), 1)

    def _hit(k):
        col = idx[:, k:k + 1]
        if offsets[k]:
            col = col + offsets[k]
        return lanes == col

    hits = _hit(0)
    for k in range(1, 4):
        hits = hits | _hit(k)
    mh = hits.astype(cd)                              # single bool -> compute-dtype cast

    # Layer 1 with the K dimension split: dense features + fused embedding tables.
    h1 = jnp.dot(x.astype(cd), w1x_ref[...].astype(cd),
                 preferred_element_type=jnp.float32)
    h1 = h1 + jnp.dot(mh, w1e_ref[...].astype(cd),
                      preferred_element_type=jnp.float32)
    h1 = jnp.maximum(h1 + b1_ref[...], 0.0)           # relu; dropout1 = identity (eval)

    # Layer 2.
    h2 = jnp.dot(h1.astype(cd), w2_ref[...].astype(cd),
                 preferred_element_type=jnp.float32)
    h2 = jnp.maximum(h2 + b2_ref[...], 0.0)           # relu; dropout2 = identity (eval)

    # Layer 3: (1, 64) x (TB, 64)^T -> lane-dense (1, TB) output row.
    out = jax.lax.dot_general(w3t_ref[...], h2,
                              dimension_numbers=(((1,), (1,)), ((), ())),
                              preferred_element_type=jnp.float32)
    o_ref[...] = (out + b3_ref[...]).astype(o_ref.dtype)


def _default_tile(batch):
    # Small/medium batch: a single grid step.  Splitting only adds ~0.35us/step pipeline
    # overhead on single-TC chips (v5e/v6e), and on v7x dual-TC only pays when each core
    # gets substantial work (>= ~1024 rows).
    if batch <= 1024:
        return batch
    # Large batch: big tiles (amortize per-step overhead), >=2 steps so v7x can shard
    # the "parallel" axis across its two TensorCores.
    for cand in (4096, 2048, 1024, 512, 256, 128):
        if batch % cand == 0 and batch // cand >= 2:
            return cand
    return batch


def prepare_params(params, input_size):
    """One-time parameter preparation (call once, reuse the result every forward).

    Folds each tiny embedding table through its matching row-slice of W1
    (T_k = emb_k @ W1[slice_k], exact reassociation) so the kernel can gather all four
    embeddings with a single multi-hot MXU matmul, splits W1 into dense/embedding parts,
    pads the fused table to a 128-lane multiple, and pre-reshapes biases / W3.

    Returns (prepared_arrays_dict, offsets) where `offsets` is a static Python tuple of
    per-column vocabulary offsets to bake into the kernel.
    """
    hi = jax.lax.Precision.HIGHEST
    tables = (params["emb1"], params["emb2"], params["emb3"], params["emb_occ"])
    emb_dim = tables[0].shape[1]
    w1 = params["w1"]                                  # (input_size + 4*E, 128)
    H1 = w1.shape[1]
    H2 = params["w2"].shape[1]

    w1x = w1[:input_size]
    folded, off = [], input_size
    for tab in tables:
        folded.append(jnp.dot(tab, w1[off:off + emb_dim], precision=hi))
        off += emb_dim
    w1e = jnp.concatenate(folded, axis=0)              # (sum(vocab), 128)
    v_tot = w1e.shape[0]
    v_pad = -(-v_tot // 128) * 128                     # pad K to lane width
    w1e = jnp.pad(w1e, ((0, v_pad - v_tot), (0, 0)))

    offs, acc = [], 0
    for tab in tables:
        offs.append(acc)
        acc += tab.shape[0]
    offsets = tuple(int(o) for o in offs)              # static Python ints

    prepared = {
        "w1x": w1x,                                    # (input_size, 128)
        "w1e": w1e,                                    # (v_pad, 128) fused embedding/W1
        "b1": params["b1"].reshape(1, H1),
        "w2": params["w2"],                            # (128, 64)
        "b2": params["b2"].reshape(1, H2),
        "w3t": params["w3"].reshape(1, H2),            # (64, 1) -> (1, 64)
        "b3": params["b3"].reshape(1, 1),
    }
    prepared = jax.tree_util.tree_map(jnp.asarray, prepared)
    return prepared, offsets


@functools.partial(jax.jit, static_argnames=("offsets", "tile_b", "compute_dtype"))
def neural_network_forward(x, cat_1, cat_2, cat_3, occupation, prepared, *,
                           offsets, tile_b=None, compute_dtype=jnp.float32):
    """Reproduces NeuralNetwork.forward (eval mode). Returns (B, 1) float32."""
    B, input_size = x.shape
    v_pad, H1 = prepared["w1e"].shape
    H2 = prepared["w2"].shape[1]

    if tile_b is None:
        tile_b = _default_tile(B)
    assert B % tile_b == 0, "batch must be a multiple of tile_b"
    assert tile_b % 128 == 0 or tile_b == B, \
        "tile_b must be a multiple of 128 (lane-dense output) or equal to B"

    # Only per-call data prep: stack the four raw categorical columns (offsets are
    # applied inside the kernel as Python constants).
    idx = jnp.stack([cat_1, cat_2, cat_3, occupation], axis=1).astype(jnp.int32)

    full = lambda i: (0, 0)
    kernel = functools.partial(_mlp_kernel, offsets=offsets,
                               compute_dtype=compute_dtype)

    out_row = pl.pallas_call(
        kernel,
        out_shape=jax.ShapeDtypeStruct((1, B), jnp.float32),
        grid=(B // tile_b,),
        in_specs=[
            pl.BlockSpec((tile_b, input_size), lambda i: (i, 0)),   # x
            pl.BlockSpec((tile_b, 4), lambda i: (i, 0)),            # categorical indices
            pl.BlockSpec((input_size, H1), full),                   # W1 dense-feature rows
            pl.BlockSpec((v_pad, H1), full),                        # fused embedding/W1 table
            pl.BlockSpec((1, H1), full),                            # b1
            pl.BlockSpec((H1, H2), full),                           # W2
            pl.BlockSpec((1, H2), full),                            # b2
            pl.BlockSpec((1, H2), full),                            # W3^T
            pl.BlockSpec((1, 1), full),                             # b3
        ],
        out_specs=pl.BlockSpec((1, tile_b), lambda i: (0, i)),      # lane-dense output row
        compiler_params=pltpu.CompilerParams(
            dimension_semantics=("parallel",)),
    )(x, idx, prepared["w1x"], prepared["w1e"], prepared["b1"], prepared["w2"],
      prepared["b2"], prepared["w3t"], prepared["b3"])

    return out_row.reshape(B, 1)


def init_params(key, input_size, embedding_size, vocab_sizes):
    """Deterministic synthetic parameters (shapes match the torch module)."""
    p1, p2, p3, occ = vocab_sizes
    cat_dim = input_size + 4 * embedding_size
    keys = jax.random.split(key, 10)
    s = 0.1
    return {
        "emb1":    s * jax.random.normal(keys[0], (p1, embedding_size), jnp.float32),
        "emb2":    s * jax.random.normal(keys[1], (p2, embedding_size), jnp.float32),
        "emb3":    s * jax.random.normal(keys[2], (p3, embedding_size), jnp.float32),
        "emb_occ": s * jax.random.normal(keys[3], (occ, embedding_size), jnp.float32),
        "w1": s * jax.random.normal(keys[4], (cat_dim, 128), jnp.float32),
        "b1": s * jax.random.normal(keys[5], (128,), jnp.float32),
        "w2": s * jax.random.normal(keys[6], (128, 64), jnp.float32),
        "b2": s * jax.random.normal(keys[7], (64,), jnp.float32),
        "w3": s * jax.random.normal(keys[8], (64, 1), jnp.float32),
        "b3": s * jax.random.normal(keys[9], (1,), jnp.float32),
    }


if __name__ == "__main__":
    # Small shapes consistent with the module: tabular features + 4 categorical columns.
    batch = 256
    input_size = 16
    embedding_size = 8
    vocab_sizes = (18, 18, 16, 21)   # (p1unique, p2unique, p3unique, occ_unique)

    key = jax.random.PRNGKey(0)
    kp, kx, k1, k2, k3, ko = jax.random.split(key, 6)

    params = init_params(kp, input_size, embedding_size, vocab_sizes)

    x = jax.random.normal(kx, (batch, input_size), jnp.float32)
    cat_1 = jax.random.randint(k1, (batch,), 0, vocab_sizes[0], jnp.int32)
    cat_2 = jax.random.randint(k2, (batch,), 0, vocab_sizes[1], jnp.int32)
    cat_3 = jax.random.randint(k3, (batch,), 0, vocab_sizes[2], jnp.int32)
    occ   = jax.random.randint(ko, (batch,), 0, vocab_sizes[3], jnp.int32)

    # One-time parameter preparation (hoisted out of the per-call path).
    prepared, offsets = prepare_params(params, input_size)
    jax.block_until_ready(prepared)

    out = neural_network_forward(x, cat_1, cat_2, cat_3, occ, prepared, offsets=offsets)
    jax.block_until_ready(out)
    assert out.shape == (batch, 1) and out.dtype == jnp.float32

    # Pure-JAX reference check (same math as the torch module, eval mode).
    e1 = params["emb1"][cat_1]; e2 = params["emb2"][cat_2]
    e3 = params["emb3"][cat_3]; eo = params["emb_occ"][occ]
    xc = jnp.concatenate([x, e1, e2, e3, eo], axis=1)
    h = jnp.maximum(xc @ params["w1"] + params["b1"], 0.0)
    h = jnp.maximum(h @ params["w2"] + params["b2"], 0.0)
    ref = h @ params["w3"] + params["b3"]
    assert jnp.allclose(out, ref, atol=1e-4, rtol=1e-4), \
        float(jnp.max(jnp.abs(out - ref)))

    print("KERNEL_OK")
</pallas_src>

<mosaic_0001>
module attributes {stable_mosaic.version = 11 : i64} {
  func.func @_mlp_kernel(%arg0: i32, %arg1: memref<256x16xf32, #tpu.memory_space<vmem>>, %arg2: memref<256x4xi32, #tpu.memory_space<vmem>>, %arg3: memref<16x128xf32, #tpu.memory_space<vmem>>, %arg4: memref<128x128xf32, #tpu.memory_space<vmem>>, %arg5: memref<1x128xf32, #tpu.memory_space<vmem>>, %arg6: memref<128x64xf32, #tpu.memory_space<vmem>>, %arg7: memref<1x64xf32, #tpu.memory_space<vmem>>, %arg8: memref<1x64xf32, #tpu.memory_space<vmem>>, %arg9: memref<1x1xf32, #tpu.memory_space<vmem>>, %arg10: memref<1x256xf32, #tpu.memory_space<vmem>>) attributes {dimension_semantics = [#tpu.dimension_semantics<parallel>], iteration_bounds = array<i64: 1>, scalar_prefetch = 0 : i64, scratch_operands = 0 : i64, tpu.core_type = #tpu.core_type<tc>, window_params = [{transform_indices = @transform_0, window_bounds = array<i64: 256, 16>}, {transform_indices = @transform_1, window_bounds = array<i64: 256, 4>}, {pipeline_mode = #tpu.pipeline_mode<synchronous>, transform_indices = @transform_2, window_bounds = array<i64: 16, 128>}, {pipeline_mode = #tpu.pipeline_mode<synchronous>, transform_indices = @transform_3, window_bounds = array<i64: 128, 128>}, {pipeline_mode = #tpu.pipeline_mode<synchronous>, transform_indices = @transform_4, window_bounds = array<i64: 1, 128>}, {pipeline_mode = #tpu.pipeline_mode<synchronous>, transform_indices = @transform_5, window_bounds = array<i64: 128, 64>}, {pipeline_mode = #tpu.pipeline_mode<synchronous>, transform_indices = @transform_6, window_bounds = array<i64: 1, 64>}, {pipeline_mode = #tpu.pipeline_mode<synchronous>, transform_indices = @transform_7, window_bounds = array<i64: 1, 64>}, {pipeline_mode = #tpu.pipeline_mode<synchronous>, transform_indices = @transform_8, window_bounds = array<i64: 1, 1>}, {transform_indices = @transform_9, window_bounds = array<i64: 1, 256>}]} {
    %c0 = arith.constant 0 : index
    %c0_0 = arith.constant 0 : index
    %0 = vector.load %arg1[%c0, %c0_0] : memref<256x16xf32, #tpu.memory_space<vmem>>, vector<256x16xf32>
    %c0_1 = arith.constant 0 : index
    %c0_2 = arith.constant 0 : index
    %1 = vector.load %arg2[%c0_1, %c0_2] : memref<256x4xi32, #tpu.memory_space<vmem>>, vector<256x4xi32>
    %2 = tpu.iota {dimensions = array<i32: 1>} : vector<256x128xi32>
    %3 = vector.extract_strided_slice %1 {offsets = [0, 0], sizes = [256, 1], strides = [1, 1]} : vector<256x4xi32> to vector<256x1xi32>
    %4 = vector.broadcast %3 : vector<256x1xi32> to vector<256x128xi32>
    %5 = arith.cmpi eq, %2, %4 : vector<256x128xi32>
    %6 = vector.extract_strided_slice %1 {offsets = [0, 1], sizes = [256, 1], strides = [1, 1]} : vector<256x4xi32> to vector<256x1xi32>
    %c18_i32 = arith.constant 18 : i32
    %7 = vector.broadcast %c18_i32 : i32 to vector<256x1xi32>
    %8 = arith.addi %6, %7 : vector<256x1xi32>
    %9 = vector.broadcast %8 : vector<256x1xi32> to vector<256x128xi32>
    %10 = arith.cmpi eq, %2, %9 : vector<256x128xi32>
    %11 = arith.ori %5, %10 : vector<256x128xi1>
    %12 = vector.extract_strided_slice %1 {offsets = [0, 2], sizes = [256, 1], strides = [1, 1]} : vector<256x4xi32> to vector<256x1xi32>
    %c36_i32 = arith.constant 36 : i32
    %13 = vector.broadcast %c36_i32 : i32 to vector<256x1xi32>
    %14 = arith.addi %12, %13 : vector<256x1xi32>
    %15 = vector.broadcast %14 : vector<256x1xi32> to vector<256x128xi32>
    %16 = arith.cmpi eq, %2, %15 : vector<256x128xi32>
    %17 = arith.ori %11, %16 : vector<256x128xi1>
    %18 = vector.extract_strided_slice %1 {offsets = [0, 3], sizes = [256, 1], strides = [1, 1]} : vector<256x4xi32> to vector<256x1xi32>
    %c52_i32 = arith.constant 52 : i32
    %19 = vector.broadcast %c52_i32 : i32 to vector<256x1xi32>
    %20 = arith.addi %18, %19 : vector<256x1xi32>
    %21 = vector.broadcast %20 : vector<256x1xi32> to vector<256x128xi32>
    %22 = arith.cmpi eq, %2, %21 : vector<256x128xi32>
    %23 = arith.ori %17, %22 : vector<256x128xi1>
    %24 = arith.extui %23 : vector<256x128xi1> to vector<256x128xi32>
    %25 = arith.sitofp %24 : vector<256x128xi32> to vector<256x128xf32>
    %c0_3 = arith.constant 0 : index
    %c0_4 = arith.constant 0 : index
    %26 = vector.load %arg3[%c0_3, %c0_4] : memref<16x128xf32, #tpu.memory_space<vmem>>, vector<16x128xf32>
    %cst = arith.constant dense<0.000000e+00> : vector<256x128xf32>
    %27 = tpu.matmul %0, %26, %cst {dimension_numbers = #tpu.dot_dimension_numbers<[1], [0], [0], [1], [0, 0, 1, 1], [], []>} : vector<256x16xf32>, vector<16x128xf32>, vector<256x128xf32> -> vector<256x128xf32>
    %c0_5 = arith.constant 0 : index
    %c0_6 = arith.constant 0 : index
    %28 = vector.load %arg4[%c0_5, %c0_6] : memref<128x128xf32, #tpu.memory_space<vmem>>, vector<128x128xf32>
    %cst_7 = arith.constant dense<0.000000e+00> : vector<256x128xf32>
    %29 = tpu.matmul %25, %28, %cst_7 {dimension_numbers = #tpu.dot_dimension_numbers<[1], [0], [0], [1], [0, 0, 1, 1], [], []>} : vector<256x128xf32>, vector<128x128xf32>, vector<256x128xf32> -> vector<256x128xf32>
    %30 = arith.addf %27, %29 : vector<256x128xf32>
    %c0_8 = arith.constant 0 : index
    %c0_9 = arith.constant 0 : index
    %31 = vector.load %arg5[%c0_8, %c0_9] : memref<1x128xf32, #tpu.memory_space<vmem>>, vector<1x128xf32>
    %32 = vector.broadcast %31 : vector<1x128xf32> to vector<256x128xf32>
    %33 = arith.addf %30, %32 : vector<256x128xf32>
    %cst_10 = arith.constant 0.000000e+00 : f32
    %34 = vector.broadcast %cst_10 : f32 to vector<256x128xf32>
    %35 = arith.maximumf %33, %34 : vector<256x128xf32>
    %c0_11 = arith.constant 0 : index
    %c0_12 = arith.constant 0 : index
    %36 = vector.load %arg6[%c0_11, %c0_12] : memref<128x64xf32, #tpu.memory_space<vmem>>, vector<128x64xf32>
    %cst_13 = arith.constant dense<0.000000e+00> : vector<256x64xf32>
    %37 = tpu.matmul %35, %36, %cst_13 {dimension_numbers = #tpu.dot_dimension_numbers<[1], [0], [0], [1], [0, 0, 1, 1], [], []>} : vector<256x128xf32>, vector<128x64xf32>, vector<256x64xf32> -> vector<256x64xf32>
    %c0_14 = arith.constant 0 : index
    %c0_15 = arith.constant 0 : index
    %38 = vector.load %arg7[%c0_14, %c0_15] : memref<1x64xf32, #tpu.memory_space<vmem>>, vector<1x64xf32>
    %39 = vector.broadcast %38 : vector<1x64xf32> to vector<256x64xf32>
    %40 = arith.addf %37, %39 : vector<256x64xf32>
    %cst_16 = arith.constant 0.000000e+00 : f32
    %41 = vector.broadcast %cst_16 : f32 to vector<256x64xf32>
    %42 = arith.maximumf %40, %41 : vector<256x64xf32>
    %c0_17 = arith.constant 0 : index
    %c0_18 = arith.constant 0 : index
    %43 = vector.load %arg8[%c0_17, %c0_18] : memref<1x64xf32, #tpu.memory_space<vmem>>, vector<1x64xf32>
    %cst_19 = arith.constant dense<0.000000e+00> : vector<1x256xf32>
    %44 = tpu.matmul %43, %42, %cst_19 {dimension_numbers = #tpu.dot_dimension_numbers<[1], [1], [0], [0], [0, 0, 1, 0], [], []>} : vector<1x64xf32>, vector<256x64xf32>, vector<1x256xf32> -> vector<1x256xf32>
    %c0_20 = arith.constant 0 : index
    %c0_21 = arith.constant 0 : index
    %45 = vector.load %arg9[%c0_20, %c0_21] : memref<1x1xf32, #tpu.memory_space<vmem>>, vector<1x1xf32>
    %46 = vector.broadcast %45 : vector<1x1xf32> to vector<1x256xf32>
    %47 = arith.addf %44, %46 : vector<1x256xf32>
    %c0_22 = arith.constant 0 : index
    %c0_23 = arith.constant 0 : index
    %48 = vector.load %arg10[%c0_22, %c0_23] : memref<1x256xf32, #tpu.memory_space<vmem>>, vector<1x256xf32>
    tpu.vector_store %arg10[%c0_22, %c0_23], %47 {strides = array<i32>} : memref<1x256xf32, #tpu.memory_space<vmem>>, vector<1x256xf32>,
    return
  }
  func.func @transform_0(%arg0: i32) -> (i32, i32) {
    %c0_i32 = arith.constant 0 : i32
    %c0_i32_0 = arith.constant 0 : i32
    return %arg0, %c0_i32 : i32, i32
  }
  func.func @transform_1(%arg0: i32) -> (i32, i32) {
    %c0_i32 = arith.constant 0 : i32
    %c0_i32_0 = arith.constant 0 : i32
    return %arg0, %c0_i32 : i32, i32
  }
  func.func @transform_2(%arg0: i32) -> (i32, i32) {
    %c0_i32 = arith.constant 0 : i32
    %c0_i32_0 = arith.constant 0 : i32
    %c0_i32_1 = arith.constant 0 : i32
    return %c0_i32, %c0_i32_0 : i32, i32
  }
  func.func @transform_3(%arg0: i32) -> (i32, i32) {
    %c0_i32 = arith.constant 0 : i32
    %c0_i32_0 = arith.constant 0 : i32
    %c0_i32_1 = arith.constant 0 : i32
    return %c0_i32, %c0_i32_0 : i32, i32
  }
  func.func @transform_4(%arg0: i32) -> (i32, i32) {
    %c0_i32 = arith.constant 0 : i32
    %c0_i32_0 = arith.constant 0 : i32
    %c0_i32_1 = arith.constant 0 : i32
    return %c0_i32, %c0_i32_0 : i32, i32
  }
  func.func @transform_5(%arg0: i32) -> (i32, i32) {
    %c0_i32 = arith.constant 0 : i32
    %c0_i32_0 = arith.constant 0 : i32
    %c0_i32_1 = arith.constant 0 : i32
    return %c0_i32, %c0_i32_0 : i32, i32
  }
  func.func @transform_6(%arg0: i32) -> (i32, i32) {
    %c0_i32 = arith.constant 0 : i32
    %c0_i32_0 = arith.constant 0 : i32
    %c0_i32_1 = arith.constant 0 : i32
    return %c0_i32, %c0_i32_0 : i32, i32
  }
  func.func @transform_7(%arg0: i32) -> (i32, i32) {
    %c0_i32 = arith.constant 0 : i32
    %c0_i32_0 = arith.constant 0 : i32
    %c0_i32_1 = arith.constant 0 : i32
    return %c0_i32, %c0_i32_0 : i32, i32
  }
  func.func @transform_8(%arg0: i32) -> (i32, i32) {
    %c0_i32 = arith.constant 0 : i32
    %c0_i32_0 = arith.constant 0 : i32
    %c0_i32_1 = arith.constant 0 : i32
    return %c0_i32, %c0_i32_0 : i32, i32
  }
  func.func @transform_9(%arg0: i32) -> (i32, i32) {
    %c0_i32 = arith.constant 0 : i32
    %c0_i32_0 = arith.constant 0 : i32
    return %c0_i32, %arg0 : i32, i32
  }
}

</mosaic_0001>

<bundles_post_ra>
// kernel: neural_network_forward.1
= control target key start
LH: loop header
LB: loop body
LE: loop exit
PB: predicated region body
PF: predicated region fallthrough
CT: control target
= control target key end

     0   :  { %s2901_s0 = inlined_call_operand.vmem [shape: f32[256,16], index: 0, kind: input, shape index: {}]   ;;  %s2902_s1 = inlined_call_operand.vmem [shape: s32[256,4], index: 1, kind: input, shape index: {}]   ;;  %s2903_s2 = inlined_call_operand.vmem [shape: f32[16,128], index: 2, kind: input, shape index: {}]   ;;  %s2904_s3 = inlined_call_operand.vmem [shape: f32[128,128], index: 3, kind: input, shape index: {}]   ;;  %s2905_s4 = inlined_call_operand.vmem [shape: f32[1,128], index: 4, kind: input, shape index: {}]   ;;  %s2906_s5 = inlined_call_operand.vmem [shape: f32[128,64], index: 5, kind: input, shape index: {}]   ;;  %s2907_s6 = inlined_call_operand.vmem [shape: f32[1,64], index: 6, kind: input, shape index: {}]   ;;  %s2908_s7 = inlined_call_operand.vmem [shape: f32[1,64], index: 7, kind: input, shape index: {}]   ;;  %s2909_s8 = inlined_call_operand.<no memory space> [shape: f32[1,1], index: 8, kind: input, shape index: {}]   ;;  %s2910_s9 = inlined_call_operand.hbm [shape: f32[1,256], index: 9, kind: output, shape index: {}]  }
   0x1   :  { %v14_v0 = vstv %s2909_s8 }
   0x2   :  { %15 = vst [vmem:[#allocation2] sm:$0x1] %v14_v0 }
   0x3   :  { %v69_v1 = vld [vmem:[%s2902_s1 + $0x10] sm:$0xff]  ;;  %v67_v2 = vld [vmem:[%s2902_s1] sm:$0xff]  ;;  %v1900_v3 = vmov 0   ;;  %v1901_v5 = vmov 2  }
   0x4   :  { %1755 = vset.pattern.permute.xlu1 %v1900_v3  ;;  %1754 = vset.pattern.permute.xlu0 %v1900_v3  ;;  %v421_v4 = vadd.s32 36, %v67_v2 }
   0x5   :  { %108 = vperm.xlu1 %1755, %v69_v1   ;;  %102 = vperm.xlu0 %1754, %v67_v2  }
   0x6   :  { %1757 = vset.pattern.permute.xlu2 %v1901_v5 }
   0x7   :  { %16 = vsyncpa [#allocation4], 0  ;;  %454 = vperm.xlu2 %1757, %v421_v4   ;;  %v68_v6 = vld [vmem:[%s2902_s1 + $0x8] sm:$0xff]  ;;  %v229_v7 = vadd.s32 18, %v67_v2  ;;  %v613_v8 = vadd.s32 52, %v67_v2  ;;  %v1902_v9 = vmov 1  }
   0x8   :  { %v1903_v10 = vmov 3   ;;  %v230_v11 = vadd.s32 18, %v68_v6  ;;  %v422_v12 = vadd.s32 36, %v68_v6  ;;  %v614_v13 = vadd.s32 52, %v68_v6  ;;  %v72_v14 = vld [vmem:[%s2902_s1 + $0x28] sm:$0xff]  ;;  %v1982_v18 = vld [vmem:[%s2902_s1 + $0x30] sm:$0xff] }
   0x9   :  { %v234_v15 = vadd.s32 18, %v72_v14  ;;  %v231_v16 = vadd.s32 18, %v69_v1  ;;  %v423_v17 = vadd.s32 36, %v69_v1  ;;  %v427_v19 = vadd.s32 36, %v1982_v18  ;;  %v70_v20 = vld [vmem:[%s2902_s1 + $0x18] sm:$0xff]  ;;  %v71_v27 = vld [vmem:[%s2902_s1 + $0x20] sm:$0xff] }
   0xa   :  { %v232_v21 = vadd.s32 18, %v70_v20  ;;  %v615_v22 = vadd.s32 52, %v69_v1  ;;  %v424_v23 = vadd.s32 36, %v70_v20  ;;  %v616_v24 = vadd.s32 52, %v70_v20  ;;  %v1997_v25 = vld [vmem:[%s2902_s1 + $0x38] sm:$0xff]  ;;  %v2007_v30 = vld [vmem:[%s2902_s1 + $0x60] sm:$0xff] }
   0xb   :  { %v620_v26 = vadd.s32 52, %v1997_v25  ;;  %v233_v28 = vadd.s32 18, %v71_v27  ;;  %v425_v29 = vadd.s32 36, %v71_v27  ;;  %v625_v31 = vadd.s32 52, %v2007_v30  ;;  %v886_v32 = vld [vmem:[%s2904_s3 + $0x78] sm:$0xff]  ;;  %v885_v34 = vld [vmem:[%s2904_s3 + $0x70] sm:$0xff] }
   0xc   :  { %v617_v33 = vadd.s32 52, %v71_v27  ;;  %887 = vmatpush.msra.mxu0 %v886_v32  ;;  %v884_v35 = vld [vmem:[%s2904_s3 + $0x68] sm:$0xff]  ;;  %v426_v36 = vadd.s32 36, %v72_v14  ;;  %v883_v37 = vld [vmem:[%s2904_s3 + $0x60] sm:$0xff]  ;;  %v618_v38 = vadd.s32 52, %v72_v14  ;;  %v882_v39 = vld [vmem:[%s2904_s3 + $0x58] sm:$0xff] }
   0xd   :  { %1756 = vset.pattern.permute.xlu1 %v1902_v9  ;;  %105 = vperm.xlu0 %1754, %v68_v6   ;;  %v881_v40 = vld [vmem:[%s2904_s3 + $0x50] sm:$0xff]  ;;  %v880_v41 = vld [vmem:[%s2904_s3 + $0x48] sm:$0xff]  ;;  %v879_v42 = vld [vmem:[%s2904_s3 + $0x40] sm:$0xff]  ;;  %v235_v44 = vadd.s32 18, %v1982_v18  ;;  %v619_v50 = vadd.s32 52, %v1982_v18  ;;  %v236_v59 = vadd.s32 18, %v1997_v25 }
   0xe   :  { %262 = vperm.xlu1 %1756, %v229_v7   ;;  %888 = vmatpush.msra.mxu0 %v885_v34  ;;  %v2044_v43 = vld [vmem:[%s2902_s1 + $0x48] sm:$0xff]  ;;  %v878_v45 = vld [vmem:[%s2904_s3 + $0x38] sm:$0xff]  ;;  %v877_v46 = vld [vmem:[%s2904_s3 + $0x30] sm:$0xff]  ;;  %vm1000_vm0 = vcmask 130048   ;;  %v428_v62 = vadd.s32 36, %v1997_v25  ;;  %s1609_s22 = sshll.u32 %s2910_s9, 4  ;;  %s1610_s22 = int_to_ptr.hbm [resolvable:$true] %s1609_s22 }
   0xf   :  { %1758 = vset.pattern.permute.xlu2 %v1903_v10  ;;  %v876_v47 = vld [vmem:[%s2904_s3 + $0x28] sm:$0xff]  ;;  %v875_v48 = vld [vmem:[%s2904_s3 + $0x20] sm:$0xff]  ;;  %v2066_v49 = vld [vmem:[%s2902_s1 + $0x70] sm:$0xff] }
  0x10   :  { %646 = vperm.xlu2 %1758, %v613_v8   ;;  %889 = vmatpush.msra.mxu0 %v884_v35  ;;  %v874_v51 = vld [vmem:[%s2904_s3 + $0x18] sm:$0xff]  ;;  %v873_v52 = vld [vmem:[%s2904_s3 + $0x10] sm:$0xff]  ;;  %v872_v54 = vld [vmem:[%s2904_s3 + $0x8] sm:$0xff] }
  0x11   :  { %v870_v55 = vld [vmem:[%s2903_s2 + $0x8] sm:$0xff]  ;;  %v871_v56 = vld [vmem:[%s2904_s3] sm:$0xff]  ;;  %v2097_v58 = vld [vmem:[%s2902_s1 + $0x50] sm:$0xff] }
  0x12   :  { %890 = vmatpush.msra.mxu0 %v883_v37  ;;  %1111 = vmatpush.msra.mxu1 %v870_v55  ;;  %v869_v57 = vld [vmem:[%s2903_s2] sm:$0xff]  ;;  %v239_v61 = vadd.s32 18, %v2097_v58  ;;  %v2111_v0 = vld [vmem:[%s2902_s1 + $0x78] sm:$0xff]  ;;  %v36_v1 = vld [vmem:[%s2901_s0 + $0x8] sm:$0xff]  ;;  %v431_v35 = vadd.s32 36, %v2097_v58  ;;  %v623_v37 = vadd.s32 52, %v2097_v58 }
  0x13   :  { %v35_v60 = vld [vmem:[%s2901_s0] sm:$0xff]  ;;  %v244_v2 = vadd.s32 18, %v2111_v0  ;;  %v38_v32 = vld [vmem:[%s2901_s0 + $0x18] sm:$0xff] }
  0x14   :  { %891 = vmatpush.msra.mxu0 %v882_v39  ;;  %1112 = vmatpush.msra.mxu1 %v869_v57  ;;  %v75_v4 = vld [vmem:[%s2902_s1 + $0x40] sm:$0xff]  ;;  %v80_v57 = vld [vmem:[%s2902_s1 + $0x68] sm:$0xff] }
  0x15   :  { %1759 = vset.pattern.permute.xlu0 %v1902_v9  ;;  %1682 = vmatmul.msk.f32.vlgmr.msra.gmra.mxu1 %vm1000_vm0, %v35_v60  ;;  %v237_v6 = vadd.s32 18, %v75_v4  ;;  %v2126_v7 = vld [vmem:[%s2902_s1 + $0xa0] sm:$0xff] }
  0x16   :  { %265 = vperm.xlu0 %1759, %v230_v11   ;;  %1760 = vset.pattern.permute.xlu1 %v1901_v5  ;;  %v249_v11 = vadd.s32 18, %v2126_v7 }
  0x17   :  { %457 = vperm.xlu1 %1760, %v422_v12   ;;  %892 = vmatpush.msra.mxu0 %v881_v40  ;;  %v429_v12 = vadd.s32 36, %v75_v4 }
  0x18   :  { %649 = vperm.xlu2 %1758, %v614_v13  }
  0x19   :  { %893 = vmatpush.msra.mxu0 %v880_v41 }
  0x1b   :  { %894 = vmatpush.msra.mxu0 %v879_v42 }
  0x1d   :  { %895 = vmatpush.msra.mxu0 %v878_v45  ;;  %1683 = vmatmul.msk.f32.gmra.mxu1 %vm1000_vm0, %v36_v1  ;;  %v626_v1 = vadd.s32 52, %v80_v57 }
  0x1e   :  { %277 = vperm.xlu0 %1759, %v234_v15   ;;  %v621_v15 = vadd.s32 52, %v75_v4 }
  0x1f   :  { %1761 = vset.pattern.permute.xlu1 %v1902_v9  ;;  %896 = vmatpush.msra.mxu0 %v877_v46 }
  0x20   :  { %268 = vperm.xlu1 %1761, %v231_v16   ;;  %1762 = vset.pattern.permute.xlu2 %v1901_v5  ;;  %v99_v16 = vlaneseq }
  0x21   :  { %460 = vperm.xlu2 %1762, %v423_v17   ;;  %897 = vmatpush.msra.mxu0 %v876_v47  ;;  %v40_v47 = vld [vmem:[%s2901_s0 + $0x28] sm:$0xff] }
  0x23   :  { %898 = vmatpush.msra.mxu0 %v875_v48 }
  0x25   :  { %899 = vmatpush.msra.mxu0 %v874_v51  ;;  %v241_v51 = vadd.s32 18, %v2007_v30 }
  0x26   :  { %1775 = vset.pattern.permute.xlu0 %v1901_v5 }
  0x27   :  { %472 = vperm.xlu0 %1775, %v427_v19   ;;  %900 = vmatpush.msra.mxu0 %v873_v52  ;;  %v2141_v19 = vand.u32 127, %v99_v16 }
  0x28   :  { %1763 = vset.pattern.permute.xlu1 %v1900_v3 }
  0x29   :  { %111 = vperm.xlu1 %1763, %v70_v20   ;;  %1764 = vset.pattern.permute.xlu2 %v1902_v9 }
  0x2a   :  { %271 = vperm.xlu2 %1764, %v232_v21   ;;  %901 = vmatpush.msra.mxu0 %v872_v54 }
  0x2c   :  { %902 = vmatpush.msra.mxu0 %v871_v56  ;;  %v41_v56 = vld [vmem:[%s2901_s0 + $0x30] sm:$0xff] }
  0x2f   :  { %1776 = vset.pattern.permute.xlu0 %v1903_v10 }
  0x30   :  { %652 = vperm.xlu0 %1776, %v615_v22   ;;  %v238_v22 = vadd.s32 18, %v2044_v43 }
  0x31   :  { %1765 = vset.pattern.permute.xlu1 %v1901_v5 }
  0x32   :  { %463 = vperm.xlu1 %1765, %v424_v23   ;;  %1766 = vset.pattern.permute.xlu2 %v1903_v10 }
  0x33   :  { %655 = vperm.xlu2 %1766, %v616_v24   ;;  %v430_v24 = vadd.s32 36, %v2044_v43 }
  0x38   :  { %667 = vperm.xlu0 %1776, %v620_v26   ;;  %v1904_v26 = vmov 1.0  }
  0x3a   :  { %1767 = vset.pattern.permute.xlu1 %v1902_v9 }
  0x3b   :  { %274 = vperm.xlu1 %1767, %v233_v28   ;;  %1768 = vset.pattern.permute.xlu2 %v1901_v5 }
  0x3c   :  { %466 = vperm.xlu2 %1768, %v425_v29   ;;  %v622_v29 = vadd.s32 52, %v2044_v43 }
  0x40   :  { %682 = vperm.xlu0 %1776, %v625_v31  }
  0x43   :  { %1769 = vset.pattern.permute.xlu1 %v1903_v10 }
  0x44   :  { %658 = vperm.xlu1 %1769, %v617_v33   ;;  %1770 = vset.pattern.permute.xlu2 %v1900_v3 }
  0x45   :  { %117 = vperm.xlu2 %1770, %v72_v14  }
  0x48   :  { %1797 = vset.pattern.permute.xlu0 %v1900_v3 }
  0x49   :  { %114 = vperm.xlu0 %1797, %v71_v27  }
  0x4c   :  { %1771 = vset.pattern.permute.xlu1 %v1901_v5 }
  0x4d   :  { %469 = vperm.xlu1 %1771, %v426_v36   ;;  %1772 = vset.pattern.permute.xlu2 %v1903_v10 }
  0x4e   :  { %661 = vperm.xlu2 %1772, %v618_v38  }
  0x51   :  { %129 = vperm.xlu0 %1797, %v2044_v43   ;;  %v39_v43 = vld [vmem:[%s2901_s0 + $0x20] sm:$0xff] }
  0x55   :  { %1773 = vset.pattern.permute.xlu1 %v1900_v3 }
  0x56   :  { %120 = vperm.xlu1 %1773, %v1982_v18   ;;  %1774 = vset.pattern.permute.xlu2 %v1902_v9  ;;  %v2138_v18 = vld [vmem:[%s2902_s1 + $0x58] sm:$0xff] }
  0x57   :  { %280 = vperm.xlu2 %1774, %v235_v44   ;;  %v432_v20 = vadd.s32 36, %v2138_v18  ;;  %v240_v41 = vadd.s32 18, %v2138_v18  ;;  %v624_v45 = vadd.s32 52, %v2138_v18 }
  0x59   :  { %144 = vperm.xlu0 %1797, %v2066_v49  }
  0x5e   :  { %1777 = vset.pattern.permute.xlu1 %v1903_v10 }
  0x5f   :  { %664 = vperm.xlu1 %1777, %v619_v50   ;;  %1778 = vset.pattern.permute.xlu2 %v1900_v3 }
  0x60   :  { %123 = vperm.xlu2 %1778, %v1997_v25   ;;  %v37_v25 = vld [vmem:[%s2901_s0 + $0x10] sm:$0xff] }
  0x61   :  { %v2079_v53 = vpop.permute.xlu2 %454  ;;  %1802 = vset.pattern.permute.xlu0 %v1902_v9  ;;  %1684 = vmatmul.msk.f32.gmra.mxu1 %vm1000_vm0, %v37_v25 }
  0x62   :  { %292 = vperm.xlu0 %1802, %v239_v61   ;;  %vm549_vm4 = vcmp.eq.s32.totalorder %v2141_v19, %v2079_v53  ;;  %v433_v53 = vadd.s32 36, %v2007_v30  ;;  %v434_v61 = vadd.s32 36, %v80_v57 }
  0x67   :  { %1779 = vset.pattern.permute.xlu1 %v1902_v9 }
  0x68   :  { %283 = vperm.xlu1 %1779, %v236_v59   ;;  %1780 = vset.pattern.permute.xlu2 %v1901_v5 }
  0x69   :  { %475 = vperm.xlu2 %1780, %v428_v62   ;;  %1685 = vmatmul.msk.f32.gmra.mxu1 %vm1000_vm0, %v38_v32  ;;  %v42_v62 = vld [vmem:[%s2901_s0 + $0x38] sm:$0xff] }
  0x6a   :  { %v647_v63 = vpop.permute.xlu2 %646  ;;  %307 = vperm.xlu0 %1802, %v244_v2   ;;  %v1285_v32 = vld [vmem:[%s2906_s5 + $0x38] sm:$0xff] }
  0x6b   :  { %vm741_vm2 = vcmp.eq.s32.totalorder %v2141_v19, %v647_v63 }
  0x70   :  { %1781 = vset.pattern.permute.xlu1 %v1900_v3 }
  0x71   :  { %126 = vperm.xlu1 %1781, %v75_v4   ;;  %1782 = vset.pattern.permute.xlu2 %v1902_v9  ;;  %v2254_v4 = vld [vmem:[%s2902_s1 + $0x80] sm:$0xff] }
  0x72   :  { %286 = vperm.xlu2 %1782, %v237_v6   ;;  %v650_v8 = vpop.permute.xlu2 %649  ;;  %322 = vperm.xlu0 %1802, %v249_v11   ;;  %v437_v6 = vadd.s32 36, %v2254_v4  ;;  %v1292_v11 = vld [vmem:[%s2906_s5 + $0x70] sm:$0xff] }
  0x73   :  { %vm742_vm12 = vcmp.eq.s32.totalorder %v2141_v19, %v650_v8  ;;  %1686 = vmatmul.msk.f32.gmra.mxu1 %vm1000_vm0, %v39_v43  ;;  %v1293_v8 = vld [vmem:[%s2906_s5 + $0x78] sm:$0xff] }
  0x74   :  { %1298 = vmatpush.msra.mxu2 %v1293_v8 }
  0x76   :  { %1299 = vmatpush.msra.mxu2 %v1292_v11  ;;  %v2416_v11 = vld [vmem:[%s2905_s4] ss:$0 sm:$0xff] }
  0x77   :  { %v2129_v13 = vpop.permute.xlu1 %108  ;;  %v103_v14 = vpop.permute.xlu0 %102 }
  0x78   :  { %vm197_vm1 = vcmp.eq.s32.totalorder %v2141_v19, %v103_v14  ;;  %v435_v14 = vadd.s32 36, %v2066_v49 }
  0x79   :  { %1783 = vset.pattern.permute.xlu1 %v1901_v5 }
  0x7a   :  { %478 = vperm.xlu1 %1783, %v429_v12   ;;  %1784 = vset.pattern.permute.xlu2 %v1903_v10  ;;  %v243_v12 = vadd.s32 18, %v2066_v49 }
  0x7b   :  { %670 = vperm.xlu2 %1784, %v621_v15   ;;  %v2133_v17 = vpop.permute.xlu2 %460  ;;  %1823 = vset.pattern.permute.xlu0 %v1901_v5 }
  0x7c   :  { %487 = vperm.xlu0 %1823, %v432_v20   ;;  %1687 = vmatmul.msk.f32.gmra.mxu1 %vm1000_vm0, %v40_v47  ;;  %v43_v20 = vld [vmem:[%s2901_s0 + $0x40] sm:$0xff] }
  0x7d   :  { %v1278_v47 = vld [vmem:[%s2906_s5] sm:$0xff] }
  0x7f   :  { %v106_v21 = vpop.permute.xlu0 %105 }
  0x80   :  { %v263_v23 = vpop.permute.xlu1 %262  ;;  %vm198_vm8 = vcmp.eq.s32.totalorder %v2141_v19, %v106_v21  ;;  %v1290_v21 = vld [vmem:[%s2906_s5 + $0x60] sm:$0xff] }
  0x81   :  { %vm357_vm3 = vcmp.eq.s32.totalorder %v2141_v19, %v263_v23  ;;  %v627_v23 = vadd.s32 52, %v2066_v49 }
  0x82   :  { %vm389_vm5 = vmor %vm197_vm1, %vm357_vm3  ;;  %1785 = vset.pattern.permute.xlu1 %v1902_v9  ;;  %vm199_vm1 = vcmp.eq.s32.totalorder %v2141_v19, %v2129_v13  ;;  %vm551_vm3 = vcmp.eq.s32.totalorder %v2141_v19, %v2133_v17  ;;  %v1291_v17 = vld [vmem:[%s2906_s5 + $0x68] sm:$0xff] }
  0x83   :  { %289 = vperm.xlu1 %1785, %v238_v22   ;;  %vm581_vm6 = vmor %vm389_vm5, %vm549_vm4  ;;  %1786 = vset.pattern.permute.xlu2 %v1901_v5 }
  0x84   :  { %vm773_vm7 = vmor %vm581_vm6, %vm741_vm2  ;;  %481 = vperm.xlu2 %1786, %v430_v24   ;;  %v272_v27 = vpop.permute.xlu2 %271  ;;  %1688 = vmatmul.msk.f32.gmra.mxu1 %vm1000_vm0, %v41_v56  ;;  %v1289_v24 = vld [vmem:[%s2906_s5 + $0x58] sm:$0xff] }
  0x85   :  { %1650 = vmatmul.msk.f32.vlgmr.msra.gmra.mxu0 %vm773_vm7, %v1904_v26  ;;  %vm360_vm7 = vcmp.eq.s32.totalorder %v2141_v19, %v272_v27  ;;  %502 = vperm.xlu0 %1823, %v437_v6   ;;  %v1288_v27 = vld [vmem:[%s2906_s5 + $0x50] sm:$0xff] }
  0x86   :  { %1300 = vmatpush.msra.mxu2 %v1291_v17 }
  0x88   :  { %v266_v28 = vpop.permute.xlu0 %265  ;;  %1301 = vmatpush.msra.mxu2 %v1290_v21 }
  0x89   :  { %vm358_vm9 = vcmp.eq.s32.totalorder %v2141_v19, %v266_v28  ;;  %v458_v31 = vpop.permute.xlu1 %457  ;;  %v1287_v28 = vld [vmem:[%s2906_s5 + $0x48] sm:$0xff] }
  0x8a   :  { %vm390_vm10 = vmor %vm198_vm8, %vm358_vm9  ;;  %vm550_vm11 = vcmp.eq.s32.totalorder %v2141_v19, %v458_v31  ;;  %1302 = vmatpush.msra.mxu2 %v1289_v24  ;;  %v2313_v31 = vld [vmem:[%s2902_s1 + $0x88] sm:$0xff] }
  0x8b   :  { %vm582_vm13 = vmor %vm390_vm10, %vm550_vm11  ;;  %1787 = vset.pattern.permute.xlu1 %v1903_v10 }
  0x8c   :  { %673 = vperm.xlu1 %1787, %v622_v29   ;;  %vm774_vm14 = vmor %vm582_vm13, %vm742_vm12  ;;  %1788 = vset.pattern.permute.xlu2 %v1900_v3  ;;  %v1286_v29 = vld [vmem:[%s2906_s5 + $0x40] sm:$0xff] }
  0x8d   :  { %1651 = vmatmul.msk.f32.gmra.mxu0 %vm774_vm14, %v1904_v26  ;;  %132 = vperm.xlu2 %1788, %v2097_v58   ;;  %v656_v33 = vpop.permute.xlu2 %655  ;;  %v242_v58 = vadd.s32 18, %v80_v57 }
  0x8e   :  { %vm744_vm12 = vcmp.eq.s32.totalorder %v2141_v19, %v656_v33  ;;  %1689 = vmatmul.msk.f32.gmra.mxu1 %vm1000_vm0, %v42_v62  ;;  %1303 = vmatpush.msra.mxu2 %v1288_v27  ;;  %v630_v33 = vadd.s32 52, %v2313_v31  ;;  %v46_v62 = vld [vmem:[%s2901_s0 + $0x58] sm:$0xff] }
  0x90   :  { %v2172_v34 = vpop.permute.xlu0 %277  ;;  %1304 = vmatpush.msra.mxu2 %v1287_v28 }
  0x92   :  { %v269_v36 = vpop.permute.xlu1 %268  ;;  %1305 = vmatpush.msra.mxu2 %v1286_v29 }
  0x93   :  { %vm359_vm15 = vcmp.eq.s32.totalorder %v2141_v19, %v269_v36  ;;  %v1284_v36 = vld [vmem:[%s2906_s5 + $0x30] sm:$0xff] }
  0x94   :  { %1789 = vset.pattern.permute.xlu1 %v1901_v5  ;;  %vm391_vm2 = vmor %vm199_vm1, %vm359_vm15  ;;  %1306 = vmatpush.msra.mxu2 %v1285_v32 }
  0x95   :  { %484 = vperm.xlu1 %1789, %v431_v35   ;;  %1790 = vset.pattern.permute.xlu2 %v1903_v10  ;;  %vm583_vm4 = vmor %vm391_vm2, %vm551_vm3  ;;  %vm362_vm3 = vcmp.eq.s32.totalorder %v2141_v19, %v2172_v34  ;;  %v436_v34 = vadd.s32 36, %v2111_v0 }
  0x96   :  { %676 = vperm.xlu2 %1790, %v623_v37   ;;  %v2178_v38 = vpop.permute.xlu2 %466  ;;  %1690 = vmatmul.msk.f32.gmra.mxu1 %vm1000_vm0, %v43_v20  ;;  %v628_v37 = vadd.s32 52, %v2111_v0  ;;  %v47_v20 = vld [vmem:[%s2901_s0 + $0x60] sm:$0xff] }
  0x97   :  { %vm553_vm1 = vcmp.eq.s32.totalorder %v2141_v19, %v2178_v38  ;;  %1307 = vmatpush.msra.mxu2 %v1284_v36  ;;  %v1283_v38 = vld [vmem:[%s2906_s5 + $0x28] sm:$0xff] }
  0x98   :  { %v48_v36 = vld [vmem:[%s2901_s0 + $0x68] sm:$0xff] }
  0x99   :  { %v2180_v39 = vpop.permute.xlu0 %472  ;;  %1308 = vmatpush.msra.mxu2 %v1283_v38 }
  0x9b   :  { %v112_v40 = vpop.permute.xlu1 %111 }
  0x9c   :  { %vm200_vm8 = vcmp.eq.s32.totalorder %v2141_v19, %v112_v40  ;;  %v44_v40 = vld [vmem:[%s2901_s0 + $0x48] sm:$0xff] }
  0x9d   :  { %1791 = vset.pattern.permute.xlu1 %v1900_v3  ;;  %vm392_vm10 = vmor %vm200_vm8, %vm360_vm7 }
  0x9e   :  { %135 = vperm.xlu1 %1791, %v2138_v18   ;;  %1792 = vset.pattern.permute.xlu2 %v1902_v9  ;;  %v2278_v18 = vld [vmem:[%s2902_s1 + $0xa8] sm:$0xff] }
  0x9f   :  { %295 = vperm.xlu2 %1792, %v240_v41   ;;  %v2189_v42 = vpop.permute.xlu2 %117  ;;  %v442_v22 = vadd.s32 36, %v2278_v18  ;;  %1691 = vmatmul.msk.f32.gmra.mxu1 %vm1000_vm0, %v44_v40  ;;  %v1281_v41 = vld [vmem:[%s2906_s5 + $0x18] sm:$0xff]  ;;  %v441_v40 = vadd.s32 36, %v2126_v7 }
  0xa1   :  { %517 = vperm.xlu0 %1823, %v442_v22  }
  0xa2   :  { %v653_v44 = vpop.permute.xlu0 %652 }
  0xa3   :  { %vm743_vm5 = vcmp.eq.s32.totalorder %v2141_v19, %v653_v44  ;;  %v1280_v44 = vld [vmem:[%s2906_s5 + $0x10] sm:$0xff] }
  0xa4   :  { %vm775_vm6 = vmor %vm583_vm4, %vm743_vm5  ;;  %v464_v46 = vpop.permute.xlu1 %463  ;;  %vm202_vm5 = vcmp.eq.s32.totalorder %v2141_v19, %v2189_v42 }
  0xa5   :  { %1652 = vmatmul.msk.f32.gmra.mxu0 %vm775_vm6, %v1904_v26  ;;  %vm552_vm9 = vcmp.eq.s32.totalorder %v2141_v19, %v464_v46  ;;  %vm394_vm8 = vmor %vm202_vm5, %vm362_vm3  ;;  %v1279_v46 = vld [vmem:[%s2906_s5 + $0x8] sm:$0xff] }
  0xa6   :  { %1793 = vset.pattern.permute.xlu1 %v1903_v10  ;;  %vm584_vm11 = vmor %vm392_vm10, %vm552_vm9 }
  0xa7   :  { %679 = vperm.xlu1 %1793, %v624_v45   ;;  %1794 = vset.pattern.permute.xlu2 %v1900_v3  ;;  %vm776_vm13 = vmor %vm584_vm11, %vm744_vm12  ;;  %v245_v45 = vadd.s32 18, %v2254_v4 }
  0xa8   :  { %138 = vperm.xlu2 %1794, %v2007_v30   ;;  %v662_v48 = vpop.permute.xlu2 %661 }
  0xa9   :  { %vm746_vm11 = vcmp.eq.s32.totalorder %v2141_v19, %v662_v48  ;;  %1828 = vset.pattern.permute.xlu0 %v1903_v10  ;;  %v2366_v48 = vld [vmem:[%s2902_s1 + $0xb0] sm:$0xff] }
  0xaa   :  { %v2211_v50 = vpop.permute.xlu0 %667  ;;  %697 = vperm.xlu0 %1828, %v630_v33  }
  0xad   :  { %1653 = vmatmul.msk.f32.gmra.mxu0 %vm776_vm13, %v1904_v26  ;;  %v275_v52 = vpop.permute.xlu1 %274 }
  0xae   :  { %vm361_vm14 = vcmp.eq.s32.totalorder %v2141_v19, %v275_v52  ;;  %v45_v52 = vld [vmem:[%s2901_s0 + $0x50] sm:$0xff] }
  0xaf   :  { %1795 = vset.pattern.permute.xlu1 %v1902_v9  ;;  %1692 = vmatmul.msk.f32.gmra.mxu1 %vm1000_vm0, %v45_v52 }
  0xb0   :  { %298 = vperm.xlu1 %1795, %v241_v51   ;;  %1796 = vset.pattern.permute.xlu2 %v1901_v5  ;;  %v635_v51 = vadd.s32 52, %v2366_v48 }
  0xb1   :  { %490 = vperm.xlu2 %1796, %v433_v53   ;;  %v281_v55 = vpop.permute.xlu2 %280  ;;  %v629_v53 = vadd.s32 52, %v2254_v4 }
  0xb2   :  { %v2218_v54 = vpop.permute.xlu0 %682  ;;  %vm363_vm13 = vcmp.eq.s32.totalorder %v2141_v19, %v281_v55  ;;  %712 = vperm.xlu0 %1828, %v635_v51  }
  0xb6   :  { %v659_v30 = vpop.permute.xlu1 %658 }
  0xb7   :  { %vm745_vm4 = vcmp.eq.s32.totalorder %v2141_v19, %v659_v30  ;;  %v2390_v30 = vld [vmem:[%s2902_s1 + $0x98] sm:$0xff]  ;;  %1693 = vmatmul.msk.f32.gmra.mxu1 %vm1000_vm0, %v46_v62 }
  0xb8   :  { %1798 = vset.pattern.permute.xlu1 %v1900_v3 }
  0xb9   :  { %141 = vperm.xlu1 %1798, %v80_v57   ;;  %1799 = vset.pattern.permute.xlu2 %v1902_v9 }
  0xba   :  { %301 = vperm.xlu2 %1799, %v242_v58   ;;  %v2229_v59 = vpop.permute.xlu2 %123  ;;  %1833 = vset.pattern.permute.xlu0 %v1900_v3  ;;  %v246_v58 = vadd.s32 18, %v2313_v31 }
  0xbb   :  { %v115_v60 = vpop.permute.xlu0 %114  ;;  %159 = vperm.xlu0 %1833, %v2390_v30  }
  0xbc   :  { %vm201_vm15 = vcmp.eq.s32.totalorder %v2141_v19, %v115_v60 }
  0xbd   :  { %vm393_vm2 = vmor %vm201_vm15, %vm361_vm14  ;;  %vm555_vm15 = vcmp.eq.s32.totalorder %v2141_v19, %v2180_v39 }
  0xbe   :  { %vm585_vm6 = vmor %vm393_vm2, %vm553_vm1 }
  0xbf   :  { %v470_v63 = vpop.permute.xlu1 %469  ;;  %vm777_vm7 = vmor %vm585_vm6, %vm745_vm4  ;;  %vm748_vm6 = vcmp.eq.s32.totalorder %v2141_v19, %v2211_v50  ;;  %1694 = vmatmul.msk.f32.gmra.mxu1 %vm1000_vm0, %v47_v20 }
  0xc0   :  { %1654 = vmatmul.msk.f32.gmra.mxu0 %vm777_vm7, %v1904_v26  ;;  %vm554_vm9 = vcmp.eq.s32.totalorder %v2141_v19, %v470_v63  ;;  %vm204_vm7 = vcmp.eq.s32.totalorder %v2141_v19, %v2229_v59 }
  0xc1   :  { %1800 = vset.pattern.permute.xlu1 %v1901_v5  ;;  %vm586_vm10 = vmor %vm394_vm8, %vm554_vm9 }
  0xc2   :  { %493 = vperm.xlu1 %1800, %v434_v61   ;;  %1801 = vset.pattern.permute.xlu2 %v1903_v10  ;;  %vm778_vm12 = vmor %vm586_vm10, %vm746_vm11  ;;  %v438_v61 = vadd.s32 36, %v2313_v31 }
  0xc3   :  { %685 = vperm.xlu2 %1801, %v626_v1   ;;  %v2248_v2 = vpop.permute.xlu2 %475  ;;  %v130_v42 = vpop.permute.xlu0 %129 }
  0xc4   :  { %vm556_vm5 = vcmp.eq.s32.totalorder %v2141_v19, %v2248_v2  ;;  %v85_v2 = vld [vmem:[%s2902_s1 + $0x90] sm:$0xff] }
  0xc5   :  { %v247_v6 = vadd.s32 18, %v85_v2  ;;  %v631_v24 = vadd.s32 52, %v85_v2 }
  0xc7   :  { %1695 = vmatmul.msk.f32.gmra.mxu1 %vm1000_vm0, %v48_v36 }
  0xc8   :  { %1655 = vmatmul.msk.f32.gmra.mxu0 %vm778_vm12, %v1904_v26  ;;  %v121_v13 = vpop.permute.xlu1 %120 }
  0xc9   :  { %vm203_vm14 = vcmp.eq.s32.totalorder %v2141_v19, %v121_v13 }
  0xca   :  { %1803 = vset.pattern.permute.xlu1 %v1902_v9  ;;  %vm395_vm1 = vmor %vm203_vm14, %vm363_vm13 }
  0xcb   :  { %304 = vperm.xlu1 %1803, %v243_v12   ;;  %1804 = vset.pattern.permute.xlu2 %v1901_v5  ;;  %vm587_vm2 = vmor %vm395_vm1, %vm555_vm15  ;;  %v2379_v56 = vpop.permute.xlu0 %144 }
  0xcc   :  { %496 = vperm.xlu2 %1804, %v435_v14   ;;  %v2270_v15 = vpop.permute.xlu2 %286 }
  0xcd   :  { %vm365_vm12 = vcmp.eq.s32.totalorder %v2141_v19, %v2270_v15  ;;  %v439_v15 = vadd.s32 36, %v85_v2 }
  0xd1   :  { %v665_v25 = vpop.permute.xlu1 %664 }
  0xd2   :  { %vm747_vm3 = vcmp.eq.s32.totalorder %v2141_v19, %v665_v25 }
  0xd3   :  { %vm779_vm4 = vmor %vm587_vm2, %vm747_vm3  ;;  %1805 = vset.pattern.permute.xlu1 %v1903_v10 }
  0xd4   :  { %688 = vperm.xlu1 %1805, %v627_v23   ;;  %1656 = vmatmul.msk.f32.gmra.mxu0 %vm779_vm4, %v1904_v26  ;;  %v293_v60 = vpop.permute.xlu0 %292  ;;  %vm206_vm4 = vcmp.eq.s32.totalorder %v2141_v19, %v130_v42 }
  0xd5   :  { %1806 = vset.pattern.permute.xlu2 %v1900_v3  ;;  %v2301_v49 = vpop.permute.xlu2 %670 }
  0xd6   :  { %147 = vperm.xlu2 %1806, %v2111_v0   ;;  %v1282_v0 = vld [vmem:[%s2906_s5 + $0x20] sm:$0xff]  ;;  %vm749_vm14 = vcmp.eq.s32.totalorder %v2141_v19, %v2301_v49 }
  0xd7   :  { %1309 = vmatpush.msra.mxu2 %v1282_v0 }
  0xd9   :  { %1310 = vmatpush.msra.mxu2 %v1281_v41 }
  0xda   :  { %v284_v35 = vpop.permute.xlu1 %283 }
  0xdb   :  { %vm364_vm8 = vcmp.eq.s32.totalorder %v2141_v19, %v284_v35  ;;  %1311 = vmatpush.msra.mxu2 %v1280_v44  ;;  %v633_v44 = vadd.s32 52, %v2126_v7 }
  0xdc   :  { %vm396_vm9 = vmor %vm204_vm7, %vm364_vm8  ;;  %1807 = vset.pattern.permute.xlu1 %v1901_v5  ;;  %v2410_v8 = vpop.permute.xlu0 %307 }
  0xdd   :  { %vm588_vm10 = vmor %vm396_vm9, %vm556_vm5  ;;  %499 = vperm.xlu1 %1807, %v436_v34   ;;  %1312 = vmatpush.msra.mxu2 %v1279_v46  ;;  %v440_v34 = vadd.s32 36, %v2390_v30 }
  0xde   :  { %vm780_vm11 = vmor %vm588_vm10, %vm748_vm6  ;;  %1808 = vset.pattern.permute.xlu2 %v1903_v10  ;;  %v2337_v39 = vpop.permute.xlu2 %481 }
  0xdf   :  { %1657 = vmatmul.msk.f32.gmra.mxu0 %vm780_vm11, %v1904_v26  ;;  %691 = vperm.xlu2 %1808, %v628_v37   ;;  %vm558_vm7 = vcmp.eq.s32.totalorder %v2141_v19, %v2337_v39  ;;  %vm367_vm11 = vcmp.eq.s32.totalorder %v2141_v19, %v293_v60  ;;  %v632_v37 = vadd.s32 52, %v2390_v30 }
  0xe0   :  { %1313 = vmatpush.msra.mxu2 %v1278_v47 }
  0xe3   :  { %v127_v43 = vpop.permute.xlu1 %126 }
  0xe4   :  { %vm205_vm13 = vcmp.eq.s32.totalorder %v2141_v19, %v127_v43  ;;  %v2429_v25 = vpop.permute.xlu0 %322 }
  0xe5   :  { %1809 = vset.pattern.permute.xlu1 %v1900_v3  ;;  %vm397_vm15 = vmor %vm205_vm13, %vm365_vm12 }
  0xe6   :  { %150 = vperm.xlu1 %1809, %v2254_v4   ;;  %v1114_v4 = vpop.f32.mrf.mxu1 }
  0xe7   :  { %1810 = vset.pattern.permute.xlu2 %v1902_v9  ;;  %v133_v50 = vpop.permute.xlu2 %132 }
  0xe8   :  { %310 = vperm.xlu2 %1810, %v245_v45   ;;  %vm207_vm12 = vcmp.eq.s32.totalorder %v2141_v19, %v133_v50 }
  0xe9   :  { %vm399_vm13 = vmor %vm207_vm12, %vm367_vm11 }
  0xec   :  { %v479_v55 = vpop.permute.xlu1 %478 }
  0xed   :  { %vm557_vm1 = vcmp.eq.s32.totalorder %v2141_v19, %v479_v55 }
  0xee   :  { %vm589_vm2 = vmor %vm397_vm15, %vm557_vm1  ;;  %1811 = vset.pattern.permute.xlu1 %v1903_v10  ;;  %v1117_v23 = vpop.f32.mrf.mxu1  ;;  %v488_v35 = vpop.permute.xlu0 %487 }
  0xef   :  { %vm781_vm3 = vmor %vm589_vm2, %vm749_vm14  ;;  %694 = vperm.xlu1 %1811, %v629_v53   ;;  %v250_v53 = vadd.s32 18, %v2278_v18 }
  0xf0   :  { %1658 = vmatmul.msk.f32.gmra.mxu0 %vm781_vm3, %v1904_v26  ;;  %1812 = vset.pattern.permute.xlu2 %v1900_v3  ;;  %v677_v57 = vpop.permute.xlu2 %676 }
  0xf1   :  { %153 = vperm.xlu2 %1812, %v2313_v31   ;;  %vm751_vm14 = vcmp.eq.s32.totalorder %v2141_v19, %v677_v57  ;;  %v248_v31 = vadd.s32 18, %v2390_v30 }
  0xf5   :  { %v290_v59 = vpop.permute.xlu1 %289 }
  0xf6   :  { %vm366_vm5 = vcmp.eq.s32.totalorder %v2141_v19, %v290_v59  ;;  %v1120_v0 = vpop.f32.mrf.mxu1  ;;  %v634_v59 = vadd.s32 52, %v2278_v18 }
  0xf7   :  { %1813 = vset.pattern.permute.xlu1 %v1902_v9  ;;  %vm398_vm6 = vmor %vm206_vm4, %vm366_vm5 }
  0xf8   :  { %313 = vperm.xlu1 %1813, %v246_v58   ;;  %vm590_vm8 = vmor %vm398_vm6, %vm558_vm7  ;;  %vm560_vm6 = vcmp.eq.s32.totalorder %v2141_v19, %v488_v35  ;;  %v50_v58 = vld [vmem:[%s2901_s0 + $0x78] sm:$0xff] }
  0xf9   :  { %1814 = vset.pattern.permute.xlu2 %v1901_v5  ;;  %v296_v63 = vpop.permute.xlu2 %295 }
  0xfa   :  { %505 = vperm.xlu2 %1814, %v438_v61   ;;  %vm368_vm3 = vcmp.eq.s32.totalorder %v2141_v19, %v296_v63  ;;  %v251_v63 = vadd.s32 18, %v2366_v48 }
  0xfe   :  { %v674_v1 = vpop.permute.xlu1 %673  ;;  %v1123_v47 = vpop.f32.mrf.mxu1 }
  0xff   :  { %vm750_vm9 = vcmp.eq.s32.totalorder %v2141_v19, %v674_v1 }
 0x100   :  { %vm782_vm10 = vmor %vm590_vm8, %vm750_vm9  ;;  %1815 = vset.pattern.permute.xlu1 %v1900_v3 }
 0x101   :  { %156 = vperm.xlu1 %1815, %v85_v2   ;;  %1659 = vmatmul.msk.f32.gmra.mxu0 %vm782_vm10, %v1904_v26  ;;  %vm753_vm10 = vcmp.eq.s32.totalorder %v2141_v19, %v2218_v54 }
 0x102   :  { %v904_v12 = vpop.f32.mrf.mxu0  ;;  %1816 = vset.pattern.permute.xlu2 %v1902_v9  ;;  %v139_v17 = vpop.permute.xlu2 %138 }
 0x103   :  { %v1115_v13 = vadd.f32 %v1114_v4, %v904_v12  ;;  %316 = vperm.xlu2 %1816, %v247_v6   ;;  %vm209_vm12 = vcmp.eq.s32.totalorder %v2141_v19, %v139_v17  ;;  %v443_v6 = vadd.s32 36, %v2366_v48 }
 0x105   :  { %v1214_v14 = vadd.f32 %v2416_v11, %v1115_v13 }
 0x106   :  { %v1126_v62 = vpop.f32.mrf.mxu1 }
 0x107   :  { %v485_v21 = vpop.permute.xlu1 %484  ;;  %v1246_v22 = vmax.f32 %v1214_v14, 0.0 }
 0x108   :  { %vm559_vm15 = vcmp.eq.s32.totalorder %v2141_v19, %v485_v21  ;;  %v90_v21 = vld [vmem:[%s2902_s1 + $0xb8] sm:$0xff] }
 0x109   :  { %vm591_vm1 = vmor %vm399_vm13, %vm559_vm15  ;;  %1817 = vset.pattern.permute.xlu1 %v1901_v5  ;;  %1314 = vmatmul.f32.vlgmr.msra.gmra.mxu2 %v1246_v22  ;;  %v252_v22 = vadd.s32 18, %v90_v21 }
 0x10a   :  { %508 = vperm.xlu1 %1817, %v439_v15   ;;  %v907_v27 = vpop.f32.mrf.mxu0  ;;  %vm783_vm2 = vmor %vm591_vm1, %vm751_vm14 }
 0x10b   :  { %v1118_v49 = vadd.f32 %v1117_v23, %v907_v27  ;;  %1660 = vmatmul.msk.f32.gmra.mxu0 %vm783_vm2, %v1904_v26  ;;  %1818 = vset.pattern.permute.xlu2 %v1903_v10  ;;  %v491_v33 = vpop.permute.xlu2 %490 }
 0x10c   :  { %700 = vperm.xlu2 %1818, %v631_v24   ;;  %vm561_vm11 = vcmp.eq.s32.totalorder %v2141_v19, %v491_v33  ;;  %v2513_v24 = vld [vmem:[%s2902_s1 + $0xc8] sm:$0xff] }
 0x10d   :  { %v1215_v28 = vadd.f32 %v2416_v11, %v1118_v49  ;;  %v254_v27 = vadd.s32 18, %v2513_v24 }
 0x10e   :  { %v1129_v15 = vpop.f32.mrf.mxu1 }
 0x10f   :  { %v1247_v29 = vmax.f32 %v1215_v28, 0.0 }
 0x110   :  { %v136_v32 = vpop.permute.xlu1 %135 }
 0x111   :  { %1317 = vmatmul.f32.gmra.mxu2 %v1247_v29  ;;  %vm208_vm4 = vcmp.eq.s32.totalorder %v2141_v19, %v136_v32  ;;  %v444_v29 = vadd.s32 36, %v90_v21 }
 0x112   :  { %1819 = vset.pattern.permute.xlu1 %v1902_v9  ;;  %vm400_vm5 = vmor %vm208_vm4, %vm368_vm3 }
 0x113   :  { %319 = vperm.xlu1 %1819, %v248_v31   ;;  %vm592_vm7 = vmor %vm400_vm5, %vm560_vm6  ;;  %v52_v31 = vld [vmem:[%s2901_s0 + $0x88] sm:$0xff] }
 0x114   :  { %1820 = vset.pattern.permute.xlu2 %v1901_v5  ;;  %v302_v39 = vpop.permute.xlu2 %301 }
 0x115   :  { %511 = vperm.xlu2 %1820, %v440_v34   ;;  %vm370_vm2 = vcmp.eq.s32.totalorder %v2141_v19, %v302_v39 }
 0x116   :  { %v1132_v33 = vpop.f32.mrf.mxu1 }
 0x119   :  { %v680_v38 = vpop.permute.xlu1 %679 }
 0x11a   :  { %vm752_vm8 = vcmp.eq.s32.totalorder %v2141_v19, %v680_v38 }
 0x11b   :  { %vm784_vm9 = vmor %vm592_vm7, %vm752_vm8  ;;  %1821 = vset.pattern.permute.xlu1 %v1903_v10 }
 0x11c   :  { %703 = vperm.xlu1 %1821, %v632_v37   ;;  %1661 = vmatmul.msk.f32.gmra.mxu0 %vm784_vm9, %v1904_v26  ;;  %vm211_vm9 = vcmp.eq.s32.totalorder %v2141_v19, %v2379_v56  ;;  %v2535_v37 = vld [vmem:[%s2902_s1 + $0xd0] sm:$0xff] }
 0x11d   :  { %1822 = vset.pattern.permute.xlu2 %v1900_v3  ;;  %v686_v45 = vpop.permute.xlu2 %685  ;;  %v447_v38 = vadd.s32 36, %v2535_v37 }
 0x11e   :  { %162 = vperm.xlu2 %1822, %v2126_v7   ;;  %v49_v7 = vld [vmem:[%s2901_s0 + $0x70] sm:$0xff]  ;;  %vm754_vm4 = vcmp.eq.s32.totalorder %v2141_v19, %v686_v45 }
 0x11f   :  { %1696 = vmatmul.msk.f32.gmra.mxu1 %vm1000_vm0, %v49_v7  ;;  %v53_v7 = vld [vmem:[%s2901_s0 + $0x90] sm:$0xff] }
 0x122   :  { %v910_v41 = vpop.f32.mrf.mxu0  ;;  %v299_v42 = vpop.permute.xlu1 %298 }
 0x123   :  { %vm369_vm13 = vcmp.eq.s32.totalorder %v2141_v19, %v299_v42  ;;  %v1121_v43 = vadd.f32 %v1120_v0, %v910_v41 }
 0x124   :  { %vm401_vm14 = vmor %vm209_vm12, %vm369_vm13  ;;  %1824 = vset.pattern.permute.xlu1 %v1901_v5 }
 0x125   :  { %vm593_vm15 = vmor %vm401_vm14, %vm561_vm11  ;;  %514 = vperm.xlu1 %1824, %v441_v40   ;;  %v1216_v46 = vadd.f32 %v2416_v11, %v1121_v43  ;;  %v503_v40 = vpop.permute.xlu0 %502 }
 0x126   :  { %vm785_vm1 = vmor %vm593_vm15, %vm753_vm10  ;;  %1825 = vset.pattern.permute.xlu2 %v1903_v10  ;;  %v497_v57 = vpop.permute.xlu2 %496 }
 0x127   :  { %1662 = vmatmul.msk.f32.gmra.mxu0 %vm785_vm1, %v1904_v26  ;;  %v1248_v54 = vmax.f32 %v1216_v46, 0.0  ;;  %706 = vperm.xlu2 %1825, %v633_v44   ;;  %vm563_vm11 = vcmp.eq.s32.totalorder %v2141_v19, %v497_v57  ;;  %vm372_vm1 = vcmp.eq.s32.totalorder %v2141_v19, %v2410_v8  ;;  %v636_v8 = vadd.s32 52, %v90_v21  ;;  %v1135_v44 = vpop.f32.mrf.mxu1 }
 0x128   :  { %1697 = vmatmul.msk.f32.gmra.mxu1 %vm1000_vm0, %v50_v58  ;;  %v446_v58 = vadd.s32 36, %v2513_v24 }
 0x129   :  { %1320 = vmatmul.f32.gmra.mxu2 %v1248_v54 }
 0x12a   :  { %v913_v50 = vpop.f32.mrf.mxu0 }
 0x12b   :  { %v1124_v51 = vadd.f32 %v1123_v47, %v913_v50  ;;  %v142_v52 = vpop.permute.xlu1 %141 }
 0x12c   :  { %vm210_vm3 = vcmp.eq.s32.totalorder %v2141_v19, %v142_v52 }
 0x12d   :  { %1826 = vset.pattern.permute.xlu1 %v1900_v3  ;;  %v1217_v55 = vadd.f32 %v2416_v11, %v1124_v51  ;;  %vm402_vm5 = vmor %vm210_vm3, %vm370_vm2  ;;  %v2544_v54 = vpop.permute.xlu0 %517 }
 0x12e   :  { %165 = vperm.xlu1 %1826, %v2278_v18   ;;  %v2486_v18 = vld [vmem:[%s2902_s1 + $0xc0] sm:$0xff] }
 0x12f   :  { %v1249_v30 = vmax.f32 %v1217_v55, 0.0  ;;  %1827 = vset.pattern.permute.xlu2 %v1902_v9  ;;  %174 = vperm.xlu0 %1833, %v2486_v18   ;;  %v253_v41 = vadd.s32 18, %v2486_v18  ;;  %v445_v43 = vadd.s32 36, %v2486_v18  ;;  %v637_v51 = vadd.s32 52, %v2486_v18  ;;  %v2562_v55 = vld [vmem:[%s2902_s1 + $0xd8] sm:$0xff] }
 0x130   :  { %325 = vperm.xlu2 %1827, %v250_v53   ;;  %v148_v61 = vpop.permute.xlu2 %147  ;;  %v638_v18 = vadd.s32 52, %v2513_v24 }
 0x131   :  { %1323 = vmatmul.f32.gmra.mxu2 %v1249_v30  ;;  %vm212_vm2 = vcmp.eq.s32.totalorder %v2141_v19, %v148_v61  ;;  %v640_v30 = vadd.s32 52, %v2562_v55  ;;  %v1138_v61 = vpop.f32.mrf.mxu1 }
 0x132   :  { %vm404_vm3 = vmor %vm212_vm2, %vm372_vm1 }
 0x134   :  { %v494_v60 = vpop.permute.xlu1 %493 }
 0x135   :  { %vm562_vm6 = vcmp.eq.s32.totalorder %v2141_v19, %v494_v60  ;;  %v698_v57 = vpop.permute.xlu0 %697 }
 0x136   :  { %vm594_vm7 = vmor %vm402_vm5, %vm562_vm6  ;;  %1829 = vset.pattern.permute.xlu1 %v1903_v10 }
 0x137   :  { %709 = vperm.xlu1 %1829, %v634_v59   ;;  %vm786_vm8 = vmor %vm594_vm7, %vm754_vm4  ;;  %1842 = vset.pattern.permute.xlu0 %v1902_v9 }
 0x138   :  { %1663 = vmatmul.msk.f32.gmra.mxu0 %vm786_vm8, %v1904_v26  ;;  %1830 = vset.pattern.permute.xlu2 %v1900_v3 }
 0x139   :  { %168 = vperm.xlu2 %1830, %v2366_v48   ;;  %v692_v14 = vpop.permute.xlu2 %691  ;;  %v51_v48 = vld [vmem:[%s2901_s0 + $0x80] sm:$0xff]  ;;  %337 = vperm.xlu0 %1842, %v254_v27  }
 0x13a   :  { %1698 = vmatmul.msk.f32.gmra.mxu1 %vm1000_vm0, %v51_v48  ;;  %vm756_vm4 = vcmp.eq.s32.totalorder %v2141_v19, %v692_v14  ;;  %v55_v14 = vld [vmem:[%s2901_s0 + $0xa0] sm:$0xff]  ;;  %v639_v48 = vadd.s32 52, %v2535_v37 }
 0x13d   :  { %v916_v1 = vpop.f32.mrf.mxu0  ;;  %v305_v2 = vpop.permute.xlu1 %304 }
 0x13e   :  { %v1127_v4 = vadd.f32 %v1126_v62, %v916_v1  ;;  %vm371_vm10 = vcmp.eq.s32.totalorder %v2141_v19, %v305_v2  ;;  %v54_v2 = vld [vmem:[%s2901_s0 + $0x98] sm:$0xff] }
 0x13f   :  { %1831 = vset.pattern.permute.xlu1 %v1902_v9  ;;  %vm403_vm12 = vmor %vm211_vm9, %vm371_vm10 }
 0x140   :  { %328 = vperm.xlu1 %1831, %v251_v63   ;;  %v1218_v12 = vadd.f32 %v2416_v11, %v1127_v4  ;;  %vm595_vm13 = vmor %vm403_vm12, %vm563_vm11  ;;  %vm565_vm11 = vcmp.eq.s32.totalorder %v2141_v19, %v503_v40 }
 0x141   :  { %1832 = vset.pattern.permute.xlu2 %v1901_v5  ;;  %1847 = vset.pattern.permute.xlu0 %v1901_v5 }
 0x142   :  { %v1250_v13 = vmax.f32 %v1218_v12, 0.0  ;;  %520 = vperm.xlu2 %1832, %v443_v6   ;;  %v311_v28 = vpop.permute.xlu2 %310  ;;  %1699 = vmatmul.msk.f32.gmra.mxu1 %vm1000_vm0, %v52_v31 }
 0x143   :  { %532 = vperm.xlu0 %1847, %v447_v38   ;;  %vm373_vm8 = vcmp.eq.s32.totalorder %v2141_v19, %v311_v28 }
 0x144   :  { %1326 = vmatmul.f32.gmra.mxu2 %v1250_v13  ;;  %v255_v13 = vadd.s32 18, %v2535_v37 }
 0x145   :  { %v919_v56 = vpop.f32.mrf.mxu0 }
 0x146   :  { %v1130_v17 = vadd.f32 %v1129_v15, %v919_v56  ;;  %v689_v20 = vpop.permute.xlu1 %688  ;;  %v2589_v15 = vpop.permute.xlu0 %712 }
 0x147   :  { %vm755_vm14 = vcmp.eq.s32.totalorder %v2141_v19, %v689_v20 }
 0x148   :  { %vm787_vm15 = vmor %vm595_vm13, %vm755_vm14  ;;  %1834 = vset.pattern.permute.xlu1 %v1900_v3  ;;  %v1219_v23 = vadd.f32 %v2416_v11, %v1130_v17  ;;  %v1141_v17 = vpop.f32.mrf.mxu1 }
 0x149   :  { %171 = vperm.xlu1 %1834, %v90_v21   ;;  %1664 = vmatmul.msk.f32.gmra.mxu0 %vm787_vm15, %v1904_v26 }
 0x14a   :  { %v1251_v49 = vmax.f32 %v1219_v23, 0.0  ;;  %1835 = vset.pattern.permute.xlu2 %v1902_v9  ;;  %1700 = vmatmul.msk.f32.gmra.mxu1 %vm1000_vm0, %v53_v7  ;;  %v2601_v23 = vld [vmem:[%s2902_s1 + $0xe8] sm:$0xff] }
 0x14b   :  { %331 = vperm.xlu2 %1835, %v252_v22   ;;  %v154_v39 = vpop.permute.xlu2 %153  ;;  %1852 = vset.pattern.permute.xlu0 %v1903_v10 }
 0x14c   :  { %1329 = vmatmul.f32.gmra.mxu2 %v1251_v49  ;;  %727 = vperm.xlu0 %1852, %v640_v30   ;;  %vm214_vm1 = vcmp.eq.s32.totalorder %v2141_v19, %v154_v39  ;;  %v256_v49 = vadd.s32 18, %v2562_v55  ;;  %v95_v39 = vld [vmem:[%s2902_s1 + $0xe0] sm:$0xff] }
 0x14f   :  { %v500_v32 = vpop.permute.xlu1 %499 }
 0x150   :  { %vm564_vm5 = vcmp.eq.s32.totalorder %v2141_v19, %v500_v32  ;;  %v1144_v31 = vpop.f32.mrf.mxu1  ;;  %v448_v32 = vadd.s32 36, %v2562_v55 }
 0x151   :  { %vm596_vm6 = vmor %vm404_vm3, %vm564_vm5  ;;  %1836 = vset.pattern.permute.xlu1 %v1901_v5  ;;  %v922_v34 = vpop.f32.mrf.mxu0  ;;  %vm758_vm3 = vcmp.eq.s32.totalorder %v2141_v19, %v698_v57  ;;  %v258_v57 = vadd.s32 18, %v2601_v23 }
 0x152   :  { %v1133_v35 = vadd.f32 %v1132_v33, %v922_v34  ;;  %523 = vperm.xlu1 %1836, %v444_v29   ;;  %vm788_vm7 = vmor %vm596_vm6, %vm756_vm4  ;;  %1701 = vmatmul.msk.f32.gmra.mxu1 %vm1000_vm0, %v54_v2  ;;  %v160_v29 = vpop.permute.xlu0 %159 }
 0x153   :  { %1665 = vmatmul.msk.f32.gmra.mxu0 %vm788_vm7, %v1904_v26  ;;  %1837 = vset.pattern.permute.xlu2 %v1903_v10 }
 0x154   :  { %v1220_v36 = vadd.f32 %v2416_v11, %v1133_v35  ;;  %715 = vperm.xlu2 %1837, %v636_v8   ;;  %v506_v50 = vpop.permute.xlu2 %505  ;;  %1857 = vset.pattern.permute.xlu0 %v1900_v3 }
 0x155   :  { %vm566_vm15 = vcmp.eq.s32.totalorder %v2141_v19, %v506_v50  ;;  %189 = vperm.xlu0 %1857, %v2601_v23  }
 0x156   :  { %v1252_v0 = vmax.f32 %v1220_v36, 0.0  ;;  %v56_v36 = vld [vmem:[%s2901_s0 + $0xa8] sm:$0xff] }
 0x158   :  { %v151_v42 = vpop.permute.xlu1 %150  ;;  %1332 = vmatmul.f32.gmra.mxu2 %v1252_v0  ;;  %v257_v0 = vadd.s32 18, %v95_v39 }
 0x159   :  { %vm213_vm9 = vcmp.eq.s32.totalorder %v2141_v19, %v151_v42 }
 0x15a   :  { %1838 = vset.pattern.permute.xlu1 %v1902_v9  ;;  %vm405_vm10 = vmor %vm213_vm9, %vm373_vm8  ;;  %1702 = vmatmul.msk.f32.gmra.mxu1 %vm1000_vm0, %v55_v14 }
 0x15b   :  { %334 = vperm.xlu1 %1838, %v253_v41   ;;  %vm597_vm12 = vmor %vm405_vm10, %vm565_vm11  ;;  %v2627_v41 = vld [vmem:[%s2902_s1 + $0xf0] sm:$0xff] }
 0x15c   :  { %v925_v45 = vpop.f32.mrf.mxu0  ;;  %1839 = vset.pattern.permute.xlu2 %v1901_v5  ;;  %v259_v42 = vadd.s32 18, %v2627_v41  ;;  %v643_v14 = vadd.s32 52, %v2627_v41 }
 0x15d   :  { %v1136_v46 = vadd.f32 %v1135_v44, %v925_v45  ;;  %526 = vperm.xlu2 %1839, %v445_v43   ;;  %v317_v59 = vpop.permute.xlu2 %316  ;;  %1862 = vset.pattern.permute.xlu0 %v1902_v9  ;;  %v449_v43 = vadd.s32 36, %v95_v39  ;;  %v57_v44 = vld [vmem:[%s2901_s0 + $0xb0] sm:$0xff] }
 0x15e   :  { %vm375_vm7 = vcmp.eq.s32.totalorder %v2141_v19, %v317_v59  ;;  %352 = vperm.xlu0 %1862, %v259_v42  }
 0x15f   :  { %v1221_v47 = vadd.f32 %v2416_v11, %v1136_v46  ;;  %v1147_v46 = vpop.f32.mrf.mxu1 }
 0x161   :  { %v695_v52 = vpop.permute.xlu1 %694  ;;  %v1253_v53 = vmax.f32 %v1221_v47, 0.0  ;;  %v641_v47 = vadd.s32 52, %v95_v39 }
 0x162   :  { %vm757_vm13 = vcmp.eq.s32.totalorder %v2141_v19, %v695_v52  ;;  %1703 = vmatmul.msk.f32.gmra.mxu1 %vm1000_vm0, %v56_v36  ;;  %v2649_v52 = vld [vmem:[%s2902_s1 + $0xf8] sm:$0xff] }
 0x163   :  { %vm789_vm14 = vmor %vm597_vm12, %vm757_vm13  ;;  %1840 = vset.pattern.permute.xlu1 %v1903_v10  ;;  %1335 = vmatmul.f32.gmra.mxu2 %v1253_v53  ;;  %v452_v53 = vadd.s32 36, %v2649_v52 }
 0x164   :  { %718 = vperm.xlu1 %1840, %v637_v51   ;;  %1666 = vmatmul.msk.f32.gmra.mxu0 %vm789_vm14, %v1904_v26  ;;  %vm216_vm14 = vcmp.eq.s32.totalorder %v2141_v19, %v160_v29 }
 0x165   :  { %1841 = vset.pattern.permute.xlu2 %v1900_v3 }
 0x166   :  { %177 = vperm.xlu2 %1841, %v2513_v24   ;;  %v701_v12 = vpop.permute.xlu2 %700  ;;  %1867 = vset.pattern.permute.xlu0 %v1901_v5 }
 0x167   :  { %vm759_vm9 = vcmp.eq.s32.totalorder %v2141_v19, %v701_v12  ;;  %547 = vperm.xlu0 %1867, %v452_v53   ;;  %v1150_v59 = vpop.f32.mrf.mxu1  ;;  %v451_v12 = vadd.s32 36, %v2627_v41 }
 0x16a   :  { %v314_v60 = vpop.permute.xlu1 %313  ;;  %1704 = vmatmul.msk.f32.gmra.mxu1 %vm1000_vm0, %v57_v44 }
 0x16b   :  { %vm374_vm2 = vcmp.eq.s32.totalorder %v2141_v19, %v314_v60 }
 0x16c   :  { %vm406_vm4 = vmor %vm214_vm1, %vm374_vm2  ;;  %1843 = vset.pattern.permute.xlu1 %v1901_v5 }
 0x16d   :  { %vm598_vm5 = vmor %vm406_vm4, %vm566_vm15  ;;  %529 = vperm.xlu1 %1843, %v446_v58   ;;  %v928_v62 = vpop.f32.mrf.mxu0  ;;  %v450_v58 = vadd.s32 36, %v2601_v23 }
 0x16e   :  { %vm790_vm6 = vmor %vm598_vm5, %vm758_vm3  ;;  %v1139_v63 = vadd.f32 %v1138_v61, %v928_v62  ;;  %1844 = vset.pattern.permute.xlu2 %v1903_v10 }
 0x16f   :  { %1667 = vmatmul.msk.f32.gmra.mxu0 %vm790_vm6, %v1904_v26  ;;  %721 = vperm.xlu2 %1844, %v638_v18   ;;  %v512_v20 = vpop.permute.xlu2 %511  ;;  %vm377_vm6 = vcmp.eq.s32.totalorder %v2141_v19, %v2429_v25 }
 0x170   :  { %v1222_v1 = vadd.f32 %v2416_v11, %v1139_v63  ;;  %vm568_vm1 = vcmp.eq.s32.totalorder %v2141_v19, %v512_v20  ;;  %v58_v63 = vld [vmem:[%s2901_s0 + $0xb8] sm:$0xff]  ;;  %1870 = vset.pattern.permute.xlu0 %v1900_v3  ;;  %v59_v20 = vld [vmem:[%s2901_s0 + $0xc0] sm:$0xff] }
 0x172   :  { %v1254_v4 = vmax.f32 %v1222_v1, 0.0  ;;  %v642_v1 = vadd.s32 52, %v2601_v23  ;;  %1705 = vmatmul.msk.f32.gmra.mxu1 %vm1000_vm0, %v58_v63 }
 0x173   :  { %v157_v6 = vpop.permute.xlu1 %156 }
 0x174   :  { %1338 = vmatmul.f32.gmra.mxu2 %v1254_v4  ;;  %vm215_vm8 = vcmp.eq.s32.totalorder %v2141_v19, %v157_v6 }
 0x175   :  { %1845 = vset.pattern.permute.xlu1 %v1900_v3  ;;  %vm407_vm10 = vmor %vm215_vm8, %vm375_vm7 }
 0x176   :  { %180 = vperm.xlu1 %1845, %v2535_v37  }
 0x177   :  { %1846 = vset.pattern.permute.xlu2 %v1902_v9 }
 0x178   :  { %340 = vperm.xlu2 %1846, %v255_v13   ;;  %v163_v33 = vpop.permute.xlu2 %162  ;;  %v1153_v13 = vpop.f32.mrf.mxu1 }
 0x179   :  { %vm217_vm7 = vcmp.eq.s32.totalorder %v2141_v19, %v163_v33 }
 0x17a   :  { %1706 = vmatmul.msk.f32.gmra.mxu1 %vm1000_vm0, %v59_v20 }
 0x17c   :  { %v509_v56 = vpop.permute.xlu1 %508 }
 0x17d   :  { %vm567_vm11 = vcmp.eq.s32.totalorder %v2141_v19, %v509_v56 }
 0x17e   :  { %vm599_vm12 = vmor %vm407_vm10, %vm567_vm11  ;;  %1848 = vset.pattern.permute.xlu1 %v1903_v10  ;;  %v931_v21 = vpop.f32.mrf.mxu0 }
 0x17f   :  { %v1142_v22 = vadd.f32 %v1141_v17, %v931_v21  ;;  %724 = vperm.xlu1 %1848, %v639_v48   ;;  %vm791_vm13 = vmor %vm599_vm12, %vm759_vm9 }
 0x180   :  { %1668 = vmatmul.msk.f32.gmra.mxu0 %vm791_vm13, %v1904_v26  ;;  %1849 = vset.pattern.permute.xlu2 %v1900_v3  ;;  %vm409_vm9 = vmor %vm217_vm7, %vm377_vm6  ;;  %vm763_vm6 = vcmp.eq.s32.totalorder %v2141_v19, %v2589_v15 }
 0x181   :  { %v1223_v24 = vadd.f32 %v2416_v11, %v1142_v22  ;;  %183 = vperm.xlu2 %1849, %v2562_v55   ;;  %v707_v40 = vpop.permute.xlu2 %706  ;;  %v260_v22 = vadd.s32 18, %v2649_v52 }
 0x182   :  { %vm761_vm8 = vcmp.eq.s32.totalorder %v2141_v19, %v707_v40 }
 0x183   :  { %v1255_v27 = vmax.f32 %v1223_v24, 0.0  ;;  %v60_v24 = vld [vmem:[%s2901_s0 + $0xc8] sm:$0xff] }
 0x184   :  { %1707 = vmatmul.msk.f32.gmra.mxu1 %vm1000_vm0, %v60_v24 }
 0x185   :  { %v320_v28 = vpop.permute.xlu1 %319  ;;  %1341 = vmatmul.f32.gmra.mxu2 %v1255_v27  ;;  %v644_v27 = vadd.s32 52, %v2649_v52 }
 0x186   :  { %vm376_vm15 = vcmp.eq.s32.totalorder %v2141_v19, %v320_v28 }
 0x187   :  { %1850 = vset.pattern.permute.xlu1 %v1902_v9  ;;  %vm408_vm2 = vmor %vm216_vm14, %vm376_vm15 }
 0x188   :  { %343 = vperm.xlu1 %1850, %v256_v49   ;;  %v934_v8 = vpop.f32.mrf.mxu0  ;;  %vm600_vm3 = vmor %vm408_vm2, %vm568_vm1  ;;  %vm570_vm1 = vcmp.eq.s32.totalorder %v2141_v19, %v2544_v54 }
 0x189   :  { %v1145_v34 = vadd.f32 %v1144_v31, %v934_v8  ;;  %1851 = vset.pattern.permute.xlu2 %v1901_v5 }
 0x18a   :  { %535 = vperm.xlu2 %1851, %v448_v32   ;;  %v326_v50 = vpop.permute.xlu2 %325 }
 0x18b   :  { %v1224_v35 = vadd.f32 %v2416_v11, %v1145_v34  ;;  %vm378_vm13 = vcmp.eq.s32.totalorder %v2141_v19, %v326_v50 }
 0x18c   :  { %v2716_v42 = vpop.f32.mrf.mxu2 }
 0x18d   :  { %v1256_v37 = vmax.f32 %v1224_v35, 0.0 }
 0x18e   :  { %v704_v38 = vpop.permute.xlu1 %703 }
 0x18f   :  { %vm760_vm4 = vcmp.eq.s32.totalorder %v2141_v19, %v704_v38  ;;  %1344 = vmatmul.f32.gmra.mxu2 %v1256_v37 }
 0x190   :  { %vm792_vm5 = vmor %vm600_vm3, %vm760_vm4  ;;  %1853 = vset.pattern.permute.xlu1 %v1900_v3 }
 0x191   :  { %186 = vperm.xlu1 %1853, %v95_v39   ;;  %1669 = vmatmul.msk.f32.gmra.mxu0 %vm792_vm5, %v1904_v26 }
 0x192   :  { %1854 = vset.pattern.permute.xlu2 %v1902_v9 }
 0x193   :  { %346 = vperm.xlu2 %1854, %v257_v0   ;;  %v169_v60 = vpop.permute.xlu2 %168 }
 0x194   :  { %vm219_vm7 = vcmp.eq.s32.totalorder %v2141_v19, %v169_v60  ;;  %v2726_v50 = vpop.f32.mrf.mxu2 }
 0x197   :  { %v515_v45 = vpop.permute.xlu1 %514 }
 0x198   :  { %vm569_vm10 = vcmp.eq.s32.totalorder %v2141_v19, %v515_v45 }
 0x199   :  { %vm601_vm11 = vmor %vm409_vm9, %vm569_vm10  ;;  %1855 = vset.pattern.permute.xlu1 %v1901_v5  ;;  %v937_v25 = vpop.f32.mrf.mxu0 }
 0x19a   :  { %vm793_vm12 = vmor %vm601_vm11, %vm761_vm8  ;;  %v1148_v7 = vadd.f32 %v1147_v46, %v937_v25  ;;  %538 = vperm.xlu1 %1855, %v449_v43   ;;  %v62_v43 = vld [vmem:[%s2901_s0 + $0xd8] sm:$0xff] }
 0x19b   :  { %1670 = vmatmul.msk.f32.gmra.mxu0 %vm793_vm12, %v1904_v26  ;;  %1856 = vset.pattern.permute.xlu2 %v1903_v10 }
 0x19c   :  { %v1225_v51 = vadd.f32 %v2416_v11, %v1148_v7  ;;  %730 = vperm.xlu2 %1856, %v641_v47   ;;  %v521_v6 = vpop.permute.xlu2 %520  ;;  %v1156_v28 = vpop.f32.mrf.mxu1 }
 0x19d   :  { %vm571_vm5 = vcmp.eq.s32.totalorder %v2141_v19, %v521_v6 }
 0x19e   :  { %v1257_v55 = vmax.f32 %v1225_v51, 0.0 }
 0x1a0   :  { %v166_v30 = vpop.permute.xlu1 %165  ;;  %1347 = vmatmul.f32.gmra.mxu2 %v1257_v55 }
 0x1a1   :  { %vm218_vm14 = vcmp.eq.s32.totalorder %v2141_v19, %v166_v30  ;;  %v175_v34 = vpop.permute.xlu0 %174 }
 0x1a2   :  { %1858 = vset.pattern.permute.xlu1 %v1902_v9  ;;  %vm410_vm15 = vmor %vm218_vm14, %vm378_vm13 }
 0x1a3   :  { %349 = vperm.xlu1 %1858, %v258_v57   ;;  %vm602_vm2 = vmor %vm410_vm15, %vm570_vm1 }
 0x1a4   :  { %v940_v61 = vpop.f32.mrf.mxu0  ;;  %1859 = vset.pattern.permute.xlu2 %v1901_v5 }
 0x1a5   :  { %v1151_v18 = vadd.f32 %v1150_v59, %v940_v61  ;;  %541 = vperm.xlu2 %1859, %v450_v58   ;;  %v332_v17 = vpop.permute.xlu2 %331  ;;  %v1159_v35 = vpop.f32.mrf.mxu1  ;;  %v63_v61 = vld [vmem:[%s2901_s0 + $0xe0] sm:$0xff] }
 0x1a6   :  { %vm380_vm12 = vcmp.eq.s32.totalorder %v2141_v19, %v332_v17 }
 0x1a7   :  { %v1226_v62 = vadd.f32 %v2416_v11, %v1151_v18 }
 0x1a9   :  { %v710_v2 = vpop.permute.xlu1 %709  ;;  %v1258_v4 = vmax.f32 %v1226_v62, 0.0 }
 0x1aa   :  { %vm762_vm3 = vcmp.eq.s32.totalorder %v2141_v19, %v710_v2 }
 0x1ab   :  { %vm794_vm4 = vmor %vm602_vm2, %vm762_vm3  ;;  %1860 = vset.pattern.permute.xlu1 %v1903_v10  ;;  %1350 = vmatmul.f32.gmra.mxu2 %v1258_v4  ;;  %v338_v40 = vpop.permute.xlu0 %337 }
 0x1ac   :  { %733 = vperm.xlu1 %1860, %v642_v1   ;;  %1671 = vmatmul.msk.f32.gmra.mxu0 %vm794_vm4, %v1904_v26  ;;  %vm221_vm4 = vcmp.eq.s32.totalorder %v2141_v19, %v175_v34  ;;  %v2730_v59 = vpop.f32.mrf.mxu2 }
 0x1ad   :  { %1861 = vset.pattern.permute.xlu2 %v1900_v3 }
 0x1ae   :  { %192 = vperm.xlu2 %1861, %v2627_v41   ;;  %v716_v23 = vpop.permute.xlu2 %715 }
 0x1af   :  { %vm764_vm14 = vcmp.eq.s32.totalorder %v2141_v19, %v716_v23 }
 0x1b2   :  { %v329_v54 = vpop.permute.xlu1 %328 }
 0x1b3   :  { %vm379_vm8 = vcmp.eq.s32.totalorder %v2141_v19, %v329_v54 }
 0x1b4   :  { %vm411_vm9 = vmor %vm219_vm7, %vm379_vm8  ;;  %1863 = vset.pattern.permute.xlu1 %v1901_v5  ;;  %v2740_v1 = vpop.f32.mrf.mxu2 }
 0x1b5   :  { %vm603_vm10 = vmor %vm411_vm9, %vm571_vm5  ;;  %544 = vperm.xlu1 %1863, %v451_v12   ;;  %v943_v48 = vpop.f32.mrf.mxu0  ;;  %v533_v55 = vpop.permute.xlu0 %532 }
 0x1b6   :  { %v1154_v56 = vadd.f32 %v1153_v13, %v943_v48  ;;  %vm795_vm11 = vmor %vm603_vm10, %vm763_vm6  ;;  %1864 = vset.pattern.permute.xlu2 %v1903_v10 }
 0x1b7   :  { %1672 = vmatmul.msk.f32.gmra.mxu0 %vm795_vm11, %v1904_v26  ;;  %736 = vperm.xlu2 %1864, %v643_v14   ;;  %v527_v31 = vpop.permute.xlu2 %526  ;;  %v1162_v45 = vpop.f32.mrf.mxu1 }
 0x1b8   :  { %v1227_v15 = vadd.f32 %v2416_v11, %v1154_v56  ;;  %vm573_vm7 = vcmp.eq.s32.totalorder %v2141_v19, %v527_v31  ;;  %v64_v56 = vld [vmem:[%s2901_s0 + $0xe8] sm:$0xff] }
 0x1ba   :  { %v1259_v5 = vmax.f32 %v1227_v15, 0.0 }
 0x1bb   :  { %v172_v21 = vpop.permute.xlu1 %171 }
 0x1bc   :  { %1353 = vmatmul.f32.gmra.mxu2 %v1259_v5  ;;  %vm220_vm13 = vcmp.eq.s32.totalorder %v2141_v19, %v172_v21 }
 0x1bd   :  { %1865 = vset.pattern.permute.xlu1 %v1900_v3  ;;  %vm412_vm15 = vmor %vm220_vm13, %vm380_vm12  ;;  %vm382_vm12 = vcmp.eq.s32.totalorder %v2141_v19, %v338_v40 }
 0x1be   :  { %195 = vperm.xlu1 %1865, %v2649_v52   ;;  %v728_v2 = vpop.permute.xlu0 %727 }
 0x1bf   :  { %1866 = vset.pattern.permute.xlu2 %v1902_v9  ;;  %v1165_v53 = vpop.f32.mrf.mxu1 }
 0x1c0   :  { %355 = vperm.xlu2 %1866, %v260_v22   ;;  %v178_v37 = vpop.permute.xlu2 %177 }
 0x1c1   :  { %vm222_vm11 = vcmp.eq.s32.totalorder %v2141_v19, %v178_v37 }
 0x1c2   :  { %vm414_vm13 = vmor %vm222_vm11, %vm382_vm12 }
 0x1c4   :  { %v524_v49 = vpop.permute.xlu1 %523 }
 0x1c5   :  { %vm572_vm1 = vcmp.eq.s32.totalorder %v2141_v19, %v524_v49 }
 0x1c6   :  { %vm604_vm2 = vmor %vm412_vm15, %vm572_vm1  ;;  %1868 = vset.pattern.permute.xlu1 %v1903_v10  ;;  %v946_v9 = vpop.f32.mrf.mxu0 }
 0x1c7   :  { %vm796_vm3 = vmor %vm604_vm2, %vm764_vm14  ;;  %v1157_v29 = vadd.f32 %v1156_v28, %v946_v9  ;;  %739 = vperm.xlu1 %1868, %v644_v27   ;;  %v1168_v6 = vpop.f32.mrf.mxu1  ;;  %v2747_v13 = vpop.f32.mrf.mxu2  ;;  %v2768_v27 = vld [vmem:[%s2905_s4] ss:$0 sm:$0xff] }
 0x1c8   :  { %1673 = vmatmul.msk.f32.gmra.mxu0 %vm796_vm3, %v1904_v26  ;;  %1869 = vset.pattern.permute.xlu2 %v1900_v3  ;;  %v61_v3 = vld [vmem:[%s2901_s0 + $0xd0] sm:$0xff] }
 0x1c9   :  { %v1228_v32 = vadd.f32 %v2416_v11, %v1157_v29  ;;  %1708 = vmatmul.msk.f32.gmra.mxu1 %vm1000_vm0, %v61_v3  ;;  %v722_v41 = vpop.permute.xlu2 %721 }
 0x1ca   :  { %vm766_vm14 = vcmp.eq.s32.totalorder %v2141_v19, %v722_v41 }
 0x1cb   :  { %v1260_v33 = vmax.f32 %v1228_v32, 0.0  ;;  %v190_v32 = vpop.permute.xlu0 %189 }
 0x1cd   :  { %v335_v8 = vpop.permute.xlu1 %334  ;;  %1356 = vmatmul.f32.gmra.mxu2 %v1260_v33 }
 0x1ce   :  { %vm381_vm5 = vcmp.eq.s32.totalorder %v2141_v19, %v335_v8 }
 0x1cf   :  { %vm413_vm6 = vmor %vm221_vm4, %vm381_vm5  ;;  %v2754_v5 = vpop.f32.mrf.mxu2  ;;  %v1171_v22 = vpop.f32.mrf.mxu1 }
 0x1d0   :  { %v949_v36 = vpop.f32.mrf.mxu0  ;;  %vm605_vm8 = vmor %vm413_vm6, %vm573_vm7  ;;  %vm575_vm6 = vcmp.eq.s32.totalorder %v2141_v19, %v533_v55 }
 0x1d1   :  { %v1160_v10 = vadd.f32 %v1159_v35, %v949_v36  ;;  %1709 = vmatmul.msk.f32.gmra.mxu1 %vm1000_vm0, %v62_v43 }
 0x1d2   :  { %v341_v25 = vpop.permute.xlu2 %340 }
 0x1d3   :  { %v1229_v38 = vadd.f32 %v2416_v11, %v1160_v10  ;;  %vm383_vm3 = vcmp.eq.s32.totalorder %v2141_v19, %v341_v25  ;;  %v66_v10 = vld [vmem:[%s2901_s0 + $0xf8] sm:$0xff] }
 0x1d5   :  { %v1261_v39 = vmax.f32 %v1229_v38, 0.0 }
 0x1d6   :  { %v719_v0 = vpop.permute.xlu1 %718 }
 0x1d7   :  { %vm765_vm9 = vcmp.eq.s32.totalorder %v2141_v19, %v719_v0  ;;  %1359 = vmatmul.f32.gmra.mxu2 %v1261_v39  ;;  %v1174_v33 = vpop.f32.mrf.mxu1  ;;  %v353_v39 = vpop.permute.xlu0 %352 }
 0x1d8   :  { %vm797_vm10 = vmor %vm605_vm8, %vm765_vm9 }
 0x1d9   :  { %1674 = vmatmul.msk.f32.gmra.mxu0 %vm797_vm10, %v1904_v26  ;;  %1710 = vmatmul.msk.f32.gmra.mxu1 %vm1000_vm0, %v63_v61 }
 0x1db   :  { %v184_v30 = vpop.permute.xlu2 %183  ;;  %v2771_v28 = vpop.f32.mrf.mxu2 }
 0x1dc   :  { %vm224_vm11 = vcmp.eq.s32.totalorder %v2141_v19, %v184_v30 }
 0x1df   :  { %v530_v44 = vpop.permute.xlu1 %529  ;;  %v1177_v43 = vpop.f32.mrf.mxu1 }
 0x1e0   :  { %vm574_vm15 = vcmp.eq.s32.totalorder %v2141_v19, %v530_v44  ;;  %v548_v55 = vpop.permute.xlu0 %547 }
 0x1e1   :  { %vm606_vm1 = vmor %vm414_vm13, %vm574_vm15  ;;  %v952_v46 = vpop.f32.mrf.mxu0  ;;  %vm768_vm13 = vcmp.eq.s32.totalorder %v2141_v19, %v728_v2  ;;  %1711 = vmatmul.msk.f32.gmra.mxu1 %vm1000_vm0, %v64_v56 }
 0x1e2   :  { %vm798_vm2 = vmor %vm606_vm1, %vm766_vm14  ;;  %v1163_v47 = vadd.f32 %v1162_v45, %v952_v46 }
 0x1e3   :  { %1675 = vmatmul.msk.f32.gmra.mxu0 %vm798_vm2, %v1904_v26 }
 0x1e4   :  { %v1230_v7 = vadd.f32 %v2416_v11, %v1163_v47  ;;  %v536_v63 = vpop.permute.xlu2 %535 }
 0x1e5   :  { %vm576_vm10 = vcmp.eq.s32.totalorder %v2141_v19, %v536_v63 }
 0x1e6   :  { %v1262_v51 = vmax.f32 %v1230_v7, 0.0  ;;  %v2775_v35 = vpop.f32.mrf.mxu2 }
 0x1e8   :  { %v181_v52 = vpop.permute.xlu1 %180  ;;  %1362 = vmatmul.f32.gmra.mxu2 %v1262_v51 }
 0x1e9   :  { %vm223_vm4 = vcmp.eq.s32.totalorder %v2141_v19, %v181_v52 }
 0x1ea   :  { %vm415_vm5 = vmor %vm223_vm4, %vm383_vm3 }
 0x1eb   :  { %vm607_vm7 = vmor %vm415_vm5, %vm575_vm6 }
 0x1ec   :  { %v955_v57 = vpop.f32.mrf.mxu0 }
 0x1ed   :  { %v1166_v58 = vadd.f32 %v1165_v53, %v955_v57  ;;  %v347_v14 = vpop.permute.xlu2 %346  ;;  %v1180_v53 = vpop.f32.mrf.mxu1 }
 0x1ee   :  { %vm385_vm2 = vcmp.eq.s32.totalorder %v2141_v19, %v347_v14 }
 0x1ef   :  { %v1231_v60 = vadd.f32 %v2416_v11, %v1166_v58 }
 0x1f1   :  { %v725_v18 = vpop.permute.xlu1 %724  ;;  %v1263_v62 = vmax.f32 %v1231_v60, 0.0 }
 0x1f2   :  { %vm767_vm8 = vcmp.eq.s32.totalorder %v2141_v19, %v725_v18 }
 0x1f3   :  { %vm799_vm9 = vmor %vm607_vm7, %vm767_vm8  ;;  %1365 = vmatmul.f32.gmra.mxu2 %v1263_v62 }
 0x1f4   :  { %1676 = vmatmul.msk.f32.gmra.mxu0 %vm799_vm9, %v1904_v26  ;;  %vm226_vm9 = vcmp.eq.s32.totalorder %v2141_v19, %v190_v32 }
 0x1f5   :  { %v1183_v63 = vpop.f32.mrf.mxu1 }
 0x1f6   :  { %v731_v20 = vpop.permute.xlu2 %730 }
 0x1f7   :  { %vm769_vm4 = vcmp.eq.s32.totalorder %v2141_v19, %v731_v20  ;;  %v2785_v0 = vpop.f32.mrf.mxu2 }
 0x1fa   :  { %v344_v4 = vpop.permute.xlu1 %343 }
 0x1fb   :  { %vm384_vm12 = vcmp.eq.s32.totalorder %v2141_v19, %v344_v4 }
 0x1fc   :  { %vm416_vm14 = vmor %vm224_vm11, %vm384_vm12 }
 0x1fd   :  { %vm608_vm15 = vmor %vm416_vm14, %vm576_vm10  ;;  %v958_v12 = vpop.f32.mrf.mxu0 }
 0x1fe   :  { %vm800_vm1 = vmor %vm608_vm15, %vm768_vm13  ;;  %v1169_v54 = vadd.f32 %v1168_v6, %v958_v12 }
 0x1ff   :  { %1677 = vmatmul.msk.f32.gmra.mxu0 %vm800_vm1, %v1904_v26  ;;  %v542_v9 = vpop.permute.xlu2 %541 }
 0x200   :  { %v1232_v48 = vadd.f32 %v2416_v11, %v1169_v54  ;;  %v65_v11 = vld [vmem:[%s2901_s0 + $0xf0] sm:$0xff]  ;;  %vm578_vm12 = vcmp.eq.s32.totalorder %v2141_v19, %v542_v9 }
 0x201   :  { %1712 = vmatmul.msk.f32.gmra.mxu1 %vm1000_vm0, %v65_v11 }
 0x202   :  { %v1264_v17 = vmax.f32 %v1232_v48, 0.0  ;;  %v1186_v48 = vpop.f32.mrf.mxu1 }
 0x203   :  { %v187_v15 = vpop.permute.xlu1 %186 }
 0x204   :  { %1368 = vmatmul.f32.gmra.mxu2 %v1264_v17  ;;  %vm225_vm3 = vcmp.eq.s32.totalorder %v2141_v19, %v187_v15 }
 0x205   :  { %vm417_vm5 = vmor %vm225_vm3, %vm385_vm2  ;;  %vm387_vm2 = vcmp.eq.s32.totalorder %v2141_v19, %v353_v39 }
 0x208   :  { %v193_v36 = vpop.permute.xlu2 %192  ;;  %v2791_v45 = vpop.f32.mrf.mxu2 }
 0x209   :  { %1713 = vmatmul.msk.f32.gmra.mxu1 %vm1000_vm0, %v66_v10  ;;  %vm227_vm1 = vcmp.eq.s32.totalorder %v2141_v19, %v193_v36 }
 0x20a   :  { %vm419_vm3 = vmor %vm227_vm1, %vm387_vm2  ;;  %vm1599_vm1 = vcmp.lt.s32.totalorder %v99_v16, 256 }
 0x20c   :  { %v539_v21 = vpop.permute.xlu1 %538 }
 0x20d   :  { %vm577_vm6 = vcmp.eq.s32.totalorder %v2141_v19, %v539_v21 }
 0x20e   :  { %vm609_vm7 = vmor %vm417_vm5, %vm577_vm6  ;;  %v961_v23 = vpop.f32.mrf.mxu0 }
 0x20f   :  { %vm801_vm8 = vmor %vm609_vm7, %vm769_vm4  ;;  %v1172_v24 = vadd.f32 %v1171_v22, %v961_v23  ;;  %v1189_v23 = vpop.f32.mrf.mxu1 }
 0x210   :  { %1678 = vmatmul.msk.f32.gmra.mxu0 %vm801_vm8, %v1904_v26 }
 0x211   :  { %v1233_v49 = vadd.f32 %v2768_v27, %v1172_v24  ;;  %v737_v40 = vpop.permute.xlu2 %736 }
 0x212   :  { %vm771_vm0 = vcmp.eq.s32.totalorder %v2141_v19, %v737_v40  ;;  %v1345_v52 = vpop.f32.mrf.mxu2 }
 0x213   :  { %v1265_v29 = vmax.f32 %v1233_v49, 0.0 }
 0x215   :  { %v350_v31 = vpop.permute.xlu1 %349  ;;  %1371 = vmatmul.f32.gmra.mxu2 %v1265_v29 }
 0x216   :  { %vm386_vm10 = vcmp.eq.s32.totalorder %v2141_v19, %v350_v31 }
 0x217   :  { %vm418_vm11 = vmor %vm226_vm9, %vm386_vm10  ;;  %vm580_vm10 = vcmp.eq.s32.totalorder %v2141_v19, %v548_v55 }
 0x218   :  { %v964_v8 = vpop.f32.mrf.mxu0  ;;  %vm610_vm13 = vmor %vm418_vm11, %vm578_vm12 }
 0x219   :  { %v1175_v34 = vadd.f32 %v1174_v33, %v964_v8 }
 0x21a   :  { %v356_v51 = vpop.permute.xlu2 %355 }
 0x21b   :  { %v1234_v37 = vadd.f32 %v2768_v27, %v1175_v34  ;;  %vm388_vm7 = vcmp.eq.s32.totalorder %v2141_v19, %v356_v51 }
 0x21d   :  { %v1266_v38 = vmax.f32 %v1234_v37, 0.0 }
 0x21e   :  { %v734_v3 = vpop.permute.xlu1 %733 }
 0x21f   :  { %vm770_vm14 = vcmp.eq.s32.totalorder %v2141_v19, %v734_v3  ;;  %1374 = vmatmul.f32.gmra.mxu2 %v1266_v38 }
 0x220   :  { %vm802_vm15 = vmor %vm610_vm13, %vm770_vm14  ;;  %vm1451_vm14 = vcmask 523264  }
 0x221   :  { %1679 = vmatmul.msk.f32.gmra.mxu0 %vm802_vm15, %v1904_v26  ;;  %vm1594_vm15 = vcmask 1040384  }
 0x223   :  { %v1348_v18 = vpop.f32.mrf.mxu2 }
 0x227   :  { %v545_v41 = vpop.permute.xlu1 %544 }
 0x228   :  { %vm579_vm4 = vcmp.eq.s32.totalorder %v2141_v19, %v545_v41 }
 0x229   :  { %vm611_vm5 = vmor %vm419_vm3, %vm579_vm4  ;;  %v967_v44 = vpop.f32.mrf.mxu0 }
 0x22a   :  { %vm803_vm6 = vmor %vm611_vm5, %vm771_vm0  ;;  %v1178_v46 = vadd.f32 %v1177_v43, %v967_v44 }
 0x22b   :  { %1680 = vmatmul.msk.f32.gmra.mxu0 %vm803_vm6, %v1904_v26 }
 0x22c   :  { %v1235_v47 = vadd.f32 %v2768_v27, %v1178_v46 }
 0x22e   :  { %v1267_v25 = vmax.f32 %v1235_v47, 0.0  ;;  %v1351_v62 = vpop.f32.mrf.mxu2 }
 0x230   :  { %v196_v7 = vpop.permute.xlu1 %195  ;;  %1377 = vmatmul.f32.gmra.mxu2 %v1267_v25 }
 0x231   :  { %vm228_vm8 = vcmp.eq.s32.totalorder %v2141_v19, %v196_v7 }
 0x232   :  { %vm420_vm9 = vmor %vm228_vm8, %vm388_vm7 }
 0x233   :  { %vm612_vm11 = vmor %vm420_vm9, %vm580_vm10 }
 0x234   :  { %v970_v57 = vpop.f32.mrf.mxu0 }
 0x235   :  { %v1181_v30 = vadd.f32 %v1180_v53, %v970_v57 }
 0x237   :  { %v1236_v58 = vadd.f32 %v2768_v27, %v1181_v30 }
 0x239   :  { %v740_v60 = vpop.permute.xlu1 %739  ;;  %v1268_v61 = vmax.f32 %v1236_v58, 0.0 }
 0x23a   :  { %vm772_vm12 = vcmp.eq.s32.totalorder %v2141_v19, %v740_v60  ;;  %v2805_v19 = vld [vmem:[%s2907_s6] ss:$0 sm:$0xff] }
 0x23b   :  { %vm804_vm13 = vmor %vm612_vm11, %vm772_vm12  ;;  %1380 = vmatmul.f32.gmra.mxu2 %v1268_v61  ;;  %v1352_v32 = vadd.f32 %v2805_v19, %v1351_v62  ;;  %v1349_v34 = vadd.f32 %v2805_v19, %v1348_v18  ;;  %v1346_v37 = vadd.f32 %v2805_v19, %v1345_v52  ;;  %v1343_v3 = vadd.f32 %v2805_v19, %v2791_v45 }
 0x23c   :  { %1681 = vmatmul.msk.f32.gmra.mxu0 %vm804_vm13, %v1904_v26  ;;  %v1340_v44 = vadd.f32 %v2805_v19, %v2785_v0  ;;  %v1337_v25 = vadd.f32 %v2805_v19, %v2775_v35  ;;  %v1334_v52 = vadd.f32 %v2805_v19, %v2771_v28  ;;  %v1331_v57 = vadd.f32 %v2805_v19, %v2754_v5 }
 0x23d   :  { %v1423_v36 = vmax.f32 %v1352_v32, 0.0  ;;  %v1422_v10 = vmax.f32 %v1349_v34, 0.0  ;;  %v1421_v39 = vmax.f32 %v1346_v37, 0.0  ;;  %v1420_v46 = vmax.f32 %v1343_v3, 0.0 }
 0x23e   :  { %v1419_v7 = vmax.f32 %v1340_v44, 0.0  ;;  %v1418_v53 = vmax.f32 %v1337_v25, 0.0  ;;  %v1417_v30 = vmax.f32 %v1334_v52, 0.0  ;;  %v1328_v35 = vadd.f32 %v2805_v19, %v2747_v13 }
 0x23f   :  { %v1354_v12 = vpop.f32.mrf.mxu2  ;;  %v1416_v60 = vmax.f32 %v1331_v57, 0.0  ;;  %v1325_v28 = vadd.f32 %v2805_v19, %v2740_v1  ;;  %v1322_v5 = vadd.f32 %v2805_v19, %v2730_v59  ;;  %v1316_v1 = vadd.f32 %v2805_v19, %v2716_v42 }
 0x240   :  { %v1355_v49 = vadd.f32 %v2805_v19, %v1354_v12  ;;  %v1415_v61 = vmax.f32 %v1328_v35, 0.0 }
 0x241   :  { %v1414_v62 = vmax.f32 %v1325_v28, 0.0  ;;  %v1411_v59 = vmax.f32 %v1316_v1, 0.0 }
 0x242   :  { %v1424_v33 = vmax.f32 %v1355_v49, 0.0 }
 0x245   :  { %v973_v2 = vpop.f32.mrf.mxu0 }
 0x246   :  { %v1184_v4 = vadd.f32 %v1183_v63, %v973_v2  ;;  %v1192_v38 = vpop.f32.mrf.mxu1 }
 0x248   :  { %v1237_v6 = vadd.f32 %v2768_v27, %v1184_v4  ;;  %v1319_v4 = vadd.f32 %v2805_v19, %v2726_v50 }
 0x24a   :  { %v1269_v54 = vmax.f32 %v1237_v6, 0.0  ;;  %v1413_v6 = vmax.f32 %v1322_v5, 0.0  ;;  %v1444_v5 = vld [vmem:[#allocation2] sm:$0x1] }
 0x24b   :  { %1447 = vperm.xlu2 %1869, %v1444_v5  }
 0x24c   :  { %1383 = vmatmul.f32.gmra.mxu2 %v1269_v54  ;;  %v1412_v54 = vmax.f32 %v1319_v4, 0.0 }
 0x24e   :  { %v1195_v45 = vpop.f32.mrf.mxu1 }
 0x250   :  { %v1357_v14 = vpop.f32.mrf.mxu2 }
 0x251   :  { %v1358_v21 = vadd.f32 %v2805_v19, %v1357_v14 }
 0x253   :  { %v1425_v9 = vmax.f32 %v1358_v21, 0.0 }
 0x256   :  { %v976_v56 = vpop.f32.mrf.mxu0  ;;  %v1198_v18 = vpop.f32.mrf.mxu1 }
 0x257   :  { %v1187_v17 = vadd.f32 %v1186_v48, %v976_v56 }
 0x259   :  { %v1238_v26 = vadd.f32 %v2768_v27, %v1187_v17 }
 0x25a   :  { %v1360_v15 = vpop.f32.mrf.mxu2 }
 0x25b   :  { %v1270_v20 = vmax.f32 %v1238_v26, 0.0  ;;  %v1361_v11 = vadd.f32 %v2805_v19, %v1360_v15 }
 0x25d   :  { %v1426_v22 = vmax.f32 %v1361_v11, 0.0  ;;  %1386 = vmatmul.f32.gmra.mxu2 %v1270_v20 }
 0x25e   :  { %v1201_v14 = vpop.f32.mrf.mxu1 }
 0x25f   :  { %1714 = vmatpush.xpose.msk.msra.mxu3 %vm1451_vm14, %v1426_v22 }
 0x260   :  { %v979_v24 = vpop.f32.mrf.mxu0 }
 0x261   :  { %v1190_v29 = vadd.f32 %v1189_v23, %v979_v24 }
 0x263   :  { %v1239_v31 = vadd.f32 %v2768_v27, %v1190_v29  ;;  %1715 = vmatpush.xpose.msk.msra.mxu3 %vm1451_vm14, %v1425_v9 }
 0x265   :  { %v1271_v8 = vmax.f32 %v1239_v31, 0.0 }
 0x267   :  { %1389 = vmatmul.f32.gmra.mxu2 %v1271_v8  ;;  %1716 = vmatpush.xpose.msk.msra.mxu3 %vm1451_vm14, %v1424_v33 }
 0x26b   :  { %1717 = vmatpush.xpose.msk.msra.mxu3 %vm1451_vm14, %v1423_v36  ;;  %v2857_v9 = vpop.f32.mrf.mxu2 }
 0x26f   :  { %1718 = vmatpush.xpose.msk.msra.mxu3 %vm1451_vm14, %v1422_v10 }
 0x271   :  { %v982_v40 = vpop.f32.mrf.mxu0 }
 0x272   :  { %v1193_v41 = vadd.f32 %v1192_v38, %v982_v40 }
 0x273   :  { %1719 = vmatpush.xpose.msk.msra.mxu3 %vm1451_vm14, %v1421_v39 }
 0x274   :  { %v1240_v43 = vadd.f32 %v2768_v27, %v1193_v41 }
 0x276   :  { %v1272_v47 = vmax.f32 %v1240_v43, 0.0  ;;  %v1366_v29 = vpop.f32.mrf.mxu2 }
 0x277   :  { %1720 = vmatpush.xpose.msk.msra.mxu3 %vm1451_vm14, %v1420_v46 }
 0x278   :  { %1392 = vmatmul.f32.gmra.mxu2 %v1272_v47 }
 0x27b   :  { %1721 = vmatpush.xpose.msk.msra.mxu3 %vm1451_vm14, %v1419_v7 }
 0x27c   :  { %v985_v51 = vpop.f32.mrf.mxu0 }
 0x27d   :  { %v1196_v55 = vadd.f32 %v1195_v45, %v985_v51 }
 0x27e   :  { %v1204_v26 = vpop.f32.mrf.mxu1 }
 0x27f   :  { %v1241_v0 = vadd.f32 %v2768_v27, %v1196_v55  ;;  %1722 = vmatpush.xpose.msk.msra.mxu3 %vm1451_vm14, %v1418_v53 }
 0x281   :  { %v1273_v58 = vmax.f32 %v1241_v0, 0.0 }
 0x283   :  { %1395 = vmatmul.f32.gmra.mxu2 %v1273_v58  ;;  %1723 = vmatpush.xpose.msk.msra.mxu3 %vm1451_vm14, %v1417_v30  ;;  %v1443_v30 = vld [vmem:[%s2908_s7] sm:$0x1]  ;;  %s1905_s7 = smov [#allocation3]  }
 0x284   :  { %s1607_s19 = sshll.u32 %s1905_s7, 4  ;;  %s1608_s19 = int_to_ptr.vmem [resolvable:$true] %s1607_s19 }
 0x286   :  { %v1207_v42 = vpop.f32.mrf.mxu1 }
 0x287   :  { %1724 = vmatpush.xpose.msk.msra.mxu3 %vm1451_vm14, %v1416_v60  ;;  %v1369_v31 = vpop.f32.mrf.mxu2 }
 0x28b   :  { %1725 = vmatpush.xpose.msk.msra.mxu3 %vm1451_vm14, %v1415_v61 }
 0x28d   :  { %v988_v63 = vpop.f32.mrf.mxu0 }
 0x28e   :  { %v1199_v2 = vadd.f32 %v1198_v18, %v988_v63 }
 0x28f   :  { %1726 = vmatpush.xpose.msk.msra.mxu3 %vm1451_vm14, %v1414_v62 }
 0x290   :  { %v1242_v13 = vadd.f32 %v2768_v27, %v1199_v2 }
 0x292   :  { %v1274_v12 = vmax.f32 %v1242_v13, 0.0 }
 0x293   :  { %1727 = vmatpush.xpose.msk.msra.mxu3 %vm1451_vm14, %v1413_v6 }
 0x294   :  { %1398 = vmatmul.f32.gmra.mxu2 %v1274_v12  ;;  %v1370_v12 = vadd.f32 %v2805_v19, %v1369_v31 }
 0x297   :  { %1728 = vmatpush.xpose.msk.msra.mxu3 %vm1451_vm14, %v1412_v54  ;;  %v1367_v54 = vadd.f32 %v2805_v19, %v1366_v29 }
 0x298   :  { %v1372_v32 = vpop.f32.mrf.mxu2 }
 0x299   :  { %v1373_v4 = vadd.f32 %v2805_v19, %v1372_v32 }
 0x29b   :  { %1729 = vmatpush.xpose.msk.msra.mxu3 %vm1451_vm14, %v1411_v59  ;;  %v1430_v1 = vmax.f32 %v1373_v4, 0.0  ;;  %v1429_v59 = vmax.f32 %v1370_v12, 0.0 }
 0x29e   :  { %v991_v48 = vpop.f32.mrf.mxu0  ;;  %1730 = vmatmul.msk.f32.vlgmr.msra.gmra.mxu3 %vm1451_vm14, %v1443_v30 }
 0x29f   :  { %v1202_v56 = vadd.f32 %v1201_v14, %v991_v48  ;;  %v1364_v14 = vadd.f32 %v2805_v19, %v2857_v9  ;;  %v1428_v48 = vmax.f32 %v1367_v54, 0.0 }
 0x2a1   :  { %v1243_v17 = vadd.f32 %v2768_v27, %v1202_v56  ;;  %v1427_v56 = vmax.f32 %v1364_v14, 0.0 }
 0x2a2   :  { %v1375_v33 = vpop.f32.mrf.mxu2 }
 0x2a3   :  { %v1275_v50 = vmax.f32 %v1243_v17, 0.0  ;;  %v1376_v2 = vadd.f32 %v2805_v19, %v1375_v33 }
 0x2a5   :  { %1401 = vmatmul.f32.gmra.mxu2 %v1275_v50  ;;  %v1431_v6 = vmax.f32 %v1376_v2, 0.0  ;;  %v1448_v50 = vpop.permute.xlu2 %1447 }
 0x2a8   :  { %v994_v15 = vpop.f32.mrf.mxu0 }
 0x2a9   :  { %v1205_v20 = vadd.f32 %v1204_v26, %v994_v15  ;;  %v1450_v26 = vperm.slane %v1448_v50, 0 }
 0x2ab   :  { %v1244_v11 = vadd.f32 %v2768_v27, %v1205_v20 }
 0x2ad   :  { %v1276_v21 = vmax.f32 %v1244_v11, 0.0 }
 0x2af   :  { %1404 = vmatmul.f32.gmra.mxu2 %v1276_v21 }
 0x2b3   :  { %v1378_v8 = vpop.f32.mrf.mxu2 }
 0x2b4   :  { %v1379_v62 = vadd.f32 %v2805_v19, %v1378_v8 }
 0x2b6   :  { %v1432_v13 = vmax.f32 %v1379_v62, 0.0 }
 0x2b9   :  { %v997_v22 = vpop.f32.mrf.mxu0 }
 0x2ba   :  { %v1208_v23 = vadd.f32 %v1207_v42, %v997_v22 }
 0x2bc   :  { %v1245_v24 = vadd.f32 %v2768_v27, %v1208_v23 }
 0x2be   :  { %v1277_v49 = vmax.f32 %v1245_v24, 0.0  ;;  %v1381_v34 = vpop.f32.mrf.mxu2 }
 0x2bf   :  { %v1382_v61 = vadd.f32 %v2805_v19, %v1381_v34 }
 0x2c0   :  { %1407 = vmatmul.f32.gmra.mxu2 %v1277_v49 }
 0x2c1   :  { %v1433_v63 = vmax.f32 %v1382_v61, 0.0 }
 0x2cf   :  { %v1384_v36 = vpop.f32.mrf.mxu2 }
 0x2d0   :  { %v1385_v60 = vadd.f32 %v2805_v19, %v1384_v36 }
 0x2d2   :  { %v1434_v18 = vmax.f32 %v1385_v60, 0.0 }
 0x2e0   :  { %v1387_v37 = vpop.f32.mrf.mxu2 }
 0x2e1   :  { %v1388_v58 = vadd.f32 %v2805_v19, %v1387_v37 }
 0x2e3   :  { %v1435_v28 = vmax.f32 %v1388_v58, 0.0 }
 0x2ea   :  { %v1390_v10 = vpop.f32.mrf.mxu2 }
 0x2eb   :  { %v1391_v0 = vadd.f32 %v2805_v19, %v1390_v10 }
 0x2ed   :  { %v1436_v35 = vmax.f32 %v1391_v0, 0.0 }
 0x2fb   :  { %v1393_v38 = vpop.f32.mrf.mxu2 }
 0x2fc   :  { %v1394_v53 = vadd.f32 %v2805_v19, %v1393_v38 }
 0x2fe   :  { %v1437_v57 = vmax.f32 %v1394_v53, 0.0 }
 0x306   :  { %v1396_v3 = vpop.f32.mrf.mxu2 }
 0x307   :  { %v1397_v51 = vadd.f32 %v2805_v19, %v1396_v3 }
 0x309   :  { %v1438_v55 = vmax.f32 %v1397_v51, 0.0 }
 0x317   :  { %v1399_v39 = vpop.f32.mrf.mxu2 }
 0x318   :  { %v1400_v7 = vadd.f32 %v2805_v19, %v1399_v39 }
 0x31a   :  { %v1439_v52 = vmax.f32 %v1400_v7, 0.0 }
 0x321   :  { %v1568_v17 = vpop.f32.mrf.mxu3 }
 0x328   :  { %v1402_v40 = vpop.f32.mrf.mxu2 }
 0x329   :  { %v1403_v47 = vadd.f32 %v2805_v19, %v1402_v40 }
 0x32b   :  { %v1440_v45 = vmax.f32 %v1403_v47, 0.0 }
 0x332   :  { %v1405_v41 = vpop.f32.mrf.mxu2 }
 0x333   :  { %v1406_v44 = vadd.f32 %v2805_v19, %v1405_v41 }
 0x335   :  { %v1441_v25 = vmax.f32 %v1406_v44, 0.0 }
 0x343   :  { %v1408_v43 = vpop.f32.mrf.mxu2 }
 0x344   :  { %v1409_v27 = vadd.f32 %v2805_v19, %v1408_v43  ;;  %v1569_v19 = vadd.f32 %v1568_v17, %v1450_v26 }
 0x346   :  { %v1442_v46 = vmax.f32 %v1409_v27, 0.0 }
 0x348   :  { %1731 = vmatpush.xpose.msk.msrb.mxu3 %vm1451_vm14, %v1442_v46 }
 0x34c   :  { %1732 = vmatpush.xpose.msk.msrb.mxu3 %vm1451_vm14, %v1441_v25 }
 0x350   :  { %1733 = vmatpush.xpose.msk.msrb.mxu3 %vm1451_vm14, %v1440_v45 }
 0x354   :  { %1734 = vmatpush.xpose.msk.msrb.mxu3 %vm1451_vm14, %v1439_v52 }
 0x358   :  { %1735 = vmatpush.xpose.msk.msrb.mxu3 %vm1451_vm14, %v1438_v55 }
 0x35c   :  { %1736 = vmatpush.xpose.msk.msrb.mxu3 %vm1451_vm14, %v1437_v57 }
 0x360   :  { %1737 = vmatpush.xpose.msk.msrb.mxu3 %vm1451_vm14, %v1436_v35 }
 0x364   :  { %1738 = vmatpush.xpose.msk.msrb.mxu3 %vm1451_vm14, %v1435_v28 }
 0x368   :  { %1739 = vmatpush.xpose.msk.msrb.mxu3 %vm1451_vm14, %v1434_v18 }
 0x36c   :  { %1740 = vmatpush.xpose.msk.msrb.mxu3 %vm1451_vm14, %v1433_v63 }
 0x370   :  { %1741 = vmatpush.xpose.msk.msrb.mxu3 %vm1451_vm14, %v1432_v13 }
 0x374   :  { %1742 = vmatpush.xpose.msk.msrb.mxu3 %vm1451_vm14, %v1431_v6 }
 0x378   :  { %1743 = vmatpush.xpose.msk.msrb.mxu3 %vm1451_vm14, %v1430_v1 }
 0x37c   :  { %1744 = vmatpush.xpose.msk.msrb.mxu3 %vm1451_vm14, %v1429_v59 }
 0x380   :  { %1745 = vmatpush.xpose.msk.msrb.mxu3 %vm1451_vm14, %v1428_v48 }
 0x384   :  { %1746 = vmatpush.xpose.msk.msrb.mxu3 %vm1451_vm14, %v1427_v56 }
 0x387   :  { %1747 = vmatmul.msk.f32.vlgmr.msrb.gmra.mxu3 %vm1451_vm14, %v1443_v30 }
 0x40a   :  { %v1588_v15 = vpop.f32.mrf.mxu3 }
 0x40b   :  { %v1589_v20 = vadd.f32 %v1588_v15, %v1450_v26 }
 0x40d   :  { %v1593_v11 = vrot.slane %v1589_v20, 7 }
 0x40f   :  { %v1595_v21 = vsel %vm1594_vm15, %v1569_v19, %v1593_v11 }
 0x410   :  { %1601 = vst.msk [vmem:[#allocation3] sm:$0x3] %vm1599_vm1, %v1595_v21 }
 0x411   :  { %1612 = dma.vmem_to_hbm [thread:$0]  %s1608_s19, 32, %s1610_s22, [#allocation4]  }
 0x412   :  { %1898 = dma.done.wait [#allocation4], 32  }
 0x413   :  { %1899 = vsyncadd [#allocation4], 4294967264 }
 0x414   :  { %1617 = vsyncpa [#allocation4], 1 }

</bundles_post_ra>
